<compile_context>
chip_gen: v7x
topology: tpu7x:2x2x1
jax: 0.10.0
libtpu: 0.0.40
codegen_flags: <defaults>
</compile_context>

<pallas_src>
import math

import jax
import jax.numpy as jnp
import numpy as np
from jax.experimental import pallas as pl
from jax.experimental.pallas import tpu as pltpu


def _make_resgcn_kernel(is_first: bool, use_bias: bool):
    """Builds the kernel body for a given (is_first, use_bias) configuration."""

    def kernel(*refs):
        idx = 0
        x_row_ref = refs[idx]; idx += 1          # (tm, f_in)  f32 row tile of x
        adj_ref = refs[idx]; idx += 1            # (tm, tk)    adjacency tile
        xk_ref = refs[idx]; idx += 1             # (tk, f_in)  x tile (K stream)
        axres_ref = None
        if not is_first:
            axres_ref = refs[idx]; idx += 1      # (tm, f_in)
        w_ref = refs[idx]; idx += 1              # (f_in, f_out_pad)
        b_ref = None
        if use_bias:
            b_ref = refs[idx]; idx += 1          # (1, f_out_pad)
        out_ref = refs[idx]; idx += 1            # (tm, f_out_pad)
        msg_ref = refs[idx]; idx += 1            # (tm, f_out_pad)
        acc_ref = refs[idx]                      # (tm, f_in) f32 scratch

        k = pl.program_id(1)

        @pl.when(k == 0)
        def _():
            acc_ref[...] = jnp.zeros_like(acc_ref)

        # Accumulate a K-slice of adj @ x into the f32 scratch accumulator.
        acc_ref[...] += jnp.dot(adj_ref[...], xk_ref[...],
                                preferred_element_type=jnp.float32)

        @pl.when(k == pl.num_programs(1) - 1)
        def _():
            ax = acc_ref[...]
            if not is_first:
                ax = (ax + axres_ref[...]) * 0.5
            w = w_ref[...]
            ixw = jnp.dot(x_row_ref[...], w, preferred_element_type=jnp.float32)
            axw = jnp.dot(ax, w, preferred_element_type=jnp.float32)
            msg_ref[...] = axw
            out = ixw + axw
            if use_bias:
                out = out + b_ref[...]           # (1, f_out_pad) broadcasts
            out_ref[...] = out

    return kernel


def resgcn_forward(x, adj, ax_residual, weight, bias=None,
                   *, is_first=False, tm=256, tk=512, stream_dtype=None):
    """Pallas implementation of ResGCN.forward. Returns (output, message)."""
    N, f_in = x.shape
    f_out = weight.shape[1]
    use_bias = bias is not None

    tm = min(tm, N)
    tk = min(tk, N)
    assert N % tm == 0 and tm % 8 == 0, "row tile must divide N and be 8-aligned"
    assert N % tk == 0 and (tk % 128 == 0 or tk == N), \
        "K tile must divide N and be 128-aligned (or equal N)"

    # Lane-dense outputs: pad the output-feature axis to a multiple of 128.
    lane = 128
    f_out_pad = ((f_out + lane - 1) // lane) * lane
    if f_out_pad != f_out:
        weight_p = jnp.pad(weight, ((0, 0), (0, f_out_pad - f_out)))
        bias_p = jnp.pad(bias, (0, f_out_pad - f_out)) if use_bias else None
    else:
        weight_p = weight
        bias_p = bias

    # Optional narrow dtype for the HBM-bound adj @ x stream (bf16 on v5e/v6e/v7x).
    if stream_dtype is not None:
        adj_s = adj.astype(stream_dtype)
        xk = x.astype(stream_dtype)
    else:
        adj_s = adj
        xk = x

    kernel = _make_resgcn_kernel(is_first, use_bias)
    grid = (N // tm, N // tk)

    in_specs = [
        pl.BlockSpec((tm, f_in), lambda i, k: (i, 0)),     # x row tile (for IXW)
        pl.BlockSpec((tm, tk), lambda i, k: (i, k)),       # adj tile
        pl.BlockSpec((tk, f_in), lambda i, k: (k, 0)),     # x K tile (for AX)
    ]
    inputs = [x, adj_s, xk]
    if not is_first:
        in_specs.append(pl.BlockSpec((tm, f_in), lambda i, k: (i, 0)))
        inputs.append(ax_residual)
    in_specs.append(pl.BlockSpec((f_in, f_out_pad), lambda i, k: (0, 0)))
    inputs.append(weight_p)
    if use_bias:
        in_specs.append(pl.BlockSpec((1, f_out_pad), lambda i, k: (0, 0)))
        inputs.append(bias_p.reshape(1, f_out_pad))

    out_pad, msg_pad = pl.pallas_call(
        kernel,
        out_shape=(jax.ShapeDtypeStruct((N, f_out_pad), jnp.float32),
                   jax.ShapeDtypeStruct((N, f_out_pad), jnp.float32)),
        grid_spec=pltpu.PrefetchScalarGridSpec(
            num_scalar_prefetch=0,
            grid=grid,
            in_specs=in_specs,
            out_specs=[
                pl.BlockSpec((tm, f_out_pad), lambda i, k: (i, 0)),  # output
                pl.BlockSpec((tm, f_out_pad), lambda i, k: (i, 0)),  # message
            ],
            scratch_shapes=[pltpu.VMEM((tm, f_in), jnp.float32)],    # AX acc
        ),
        compiler_params=pltpu.CompilerParams(
            dimension_semantics=("parallel", "arbitrary")),
    )(*inputs)

    if f_out_pad != f_out:
        return out_pad[:, :f_out], msg_pad[:, :f_out]
    return out_pad, msg_pad


def resgcn_reference(x, adj, ax_residual, weight, bias, is_first):
    ixw = x @ weight
    ax = adj @ x
    if not is_first:
        ax = (ax + ax_residual) / 2.0
    axw = ax @ weight
    out = ixw + axw
    if bias is not None:
        out = out + bias
    return out, axw


if __name__ == "__main__":
    # Small, module-consistent shapes that still exercise the 2-D (rows, K) grid.
    N = 512           # number of nodes
    IN_FEATURES = 32
    OUT_FEATURES = 32
    TM, TK = 256, 256  # grid = (2, 2): 2 row tiles x 2 K-accumulation steps

    key = jax.random.PRNGKey(0)
    kx, kadj, kres, kw, kb = jax.random.split(key, 5)

    x = jax.random.normal(kx, (N, IN_FEATURES), dtype=jnp.float32)
    adj = jax.random.uniform(kadj, (N, N), dtype=jnp.float32)
    ax_residual = jax.random.normal(kres, (N, IN_FEATURES), dtype=jnp.float32)

    # Deterministic parameter init mirroring reset_parameters():
    # uniform(-stdv, stdv) with stdv = 1/sqrt(out_features).
    stdv = 1.0 / math.sqrt(OUT_FEATURES)
    weight = jax.random.uniform(kw, (IN_FEATURES, OUT_FEATURES),
                                minval=-stdv, maxval=stdv, dtype=jnp.float32)
    bias = jax.random.uniform(kb, (OUT_FEATURES,),
                              minval=-stdv, maxval=stdv, dtype=jnp.float32)

    # is_first=False path (residual averaging) with bias.
    out, msg = resgcn_forward(x, adj, ax_residual, weight, bias,
                              is_first=False, tm=TM, tk=TK)
    out = jax.block_until_ready(out)
    msg = jax.block_until_ready(msg)
    ref_out, ref_msg = resgcn_reference(x, adj, ax_residual, weight, bias,
                                        is_first=False)
    np.testing.assert_allclose(np.asarray(out), np.asarray(ref_out),
                               rtol=1e-4, atol=1e-4)
    np.testing.assert_allclose(np.asarray(msg), np.asarray(ref_msg),
                               rtol=1e-4, atol=1e-4)

    # is_first=True path (no residual DMA) with bias.
    out1, msg1 = resgcn_forward(x, adj, ax_residual, weight, bias,
                                is_first=True, tm=TM, tk=TK)
    jax.block_until_ready(out1)
    ref_out1, ref_msg1 = resgcn_reference(x, adj, ax_residual, weight, bias,
                                          is_first=True)
    np.testing.assert_allclose(np.asarray(out1), np.asarray(ref_out1),
                               rtol=1e-4, atol=1e-4)
    np.testing.assert_allclose(np.asarray(msg1), np.asarray(ref_msg1),
                               rtol=1e-4, atol=1e-4)

    # bias=None path (no bias DMA).
    out2, msg2 = resgcn_forward(x, adj, ax_residual, weight, None,
                                is_first=False, tm=TM, tk=TK)
    jax.block_until_ready(out2)
    ref_out2, ref_msg2 = resgcn_reference(x, adj, ax_residual, weight, None,
                                          is_first=False)
    np.testing.assert_allclose(np.asarray(out2), np.asarray(ref_out2),
                               rtol=1e-4, atol=1e-4)
    np.testing.assert_allclose(np.asarray(msg2), np.asarray(ref_msg2),
                               rtol=1e-4, atol=1e-4)

    print("KERNEL_OK")
</pallas_src>

<mosaic_0001>
module attributes {stable_mosaic.version = 11 : i64} {
  func.func @kernel(%arg0: i32, %arg1: i32, %arg2: memref<256x32xf32, #tpu.memory_space<vmem>>, %arg3: memref<256x256xf32, #tpu.memory_space<vmem>>, %arg4: memref<256x32xf32, #tpu.memory_space<vmem>>, %arg5: memref<256x32xf32, #tpu.memory_space<vmem>>, %arg6: memref<32x128xf32, #tpu.memory_space<vmem>>, %arg7: memref<1x128xf32, #tpu.memory_space<vmem>>, %arg8: memref<256x128xf32, #tpu.memory_space<vmem>>, %arg9: memref<256x128xf32, #tpu.memory_space<vmem>>, %arg10: memref<256x32xf32, #tpu.memory_space<vmem>>) attributes {dimension_semantics = [#tpu.dimension_semantics<parallel>, #tpu.dimension_semantics<arbitrary>], iteration_bounds = array<i64: 2, 2>, scalar_prefetch = 0 : i64, scratch_operands = 1 : i64, tpu.core_type = #tpu.core_type<tc>, window_params = [{transform_indices = @transform_0, window_bounds = array<i64: 256, 32>}, {transform_indices = @transform_1, window_bounds = array<i64: 256, 256>}, {transform_indices = @transform_2, window_bounds = array<i64: 256, 32>}, {transform_indices = @transform_3, window_bounds = array<i64: 256, 32>}, {pipeline_mode = #tpu.pipeline_mode<synchronous>, transform_indices = @transform_4, window_bounds = array<i64: 32, 128>}, {pipeline_mode = #tpu.pipeline_mode<synchronous>, transform_indices = @transform_5, window_bounds = array<i64: 1, 128>}, {transform_indices = @transform_6, window_bounds = array<i64: 256, 128>}, {transform_indices = @transform_7, window_bounds = array<i64: 256, 128>}]} {
    %c0_i32 = arith.constant 0 : i32
    %0 = arith.cmpi eq, %arg1, %c0_i32 : i32
    %1 = arith.extui %0 : i1 to i32
    %c0_i32_0 = arith.constant 0 : i32
    %2 = arith.cmpi ne, %1, %c0_i32_0 : i32
    scf.if %2 {
      %cst_9 = arith.constant 0.000000e+00 : f32
      %12 = vector.broadcast %cst_9 : f32 to vector<256x32xf32>
      %c0_10 = arith.constant 0 : index
      %c0_11 = arith.constant 0 : index
      %13 = vector.load %arg10[%c0_10, %c0_11] : memref<256x32xf32, #tpu.memory_space<vmem>>, vector<256x32xf32>
      tpu.vector_store %arg10[%c0_10, %c0_11], %12 {strides = array<i32>} : memref<256x32xf32, #tpu.memory_space<vmem>>, vector<256x32xf32>,
    } else {
    }
    %c0 = arith.constant 0 : index
    %c0_1 = arith.constant 0 : index
    %3 = vector.load %arg10[%c0, %c0_1] : memref<256x32xf32, #tpu.memory_space<vmem>>, vector<256x32xf32>
    %c0_2 = arith.constant 0 : index
    %c0_3 = arith.constant 0 : index
    %4 = vector.load %arg3[%c0_2, %c0_3] : memref<256x256xf32, #tpu.memory_space<vmem>>, vector<256x256xf32>
    %c0_4 = arith.constant 0 : index
    %c0_5 = arith.constant 0 : index
    %5 = vector.load %arg4[%c0_4, %c0_5] : memref<256x32xf32, #tpu.memory_space<vmem>>, vector<256x32xf32>
    %cst = arith.constant dense<0.000000e+00> : vector<256x32xf32>
    %6 = tpu.matmul %4, %5, %cst {dimension_numbers = #tpu.dot_dimension_numbers<[1], [0], [0], [1], [0, 0, 1, 1], [], []>} : vector<256x256xf32>, vector<256x32xf32>, vector<256x32xf32> -> vector<256x32xf32>
    %7 = arith.addf %3, %6 : vector<256x32xf32>
    %c0_6 = arith.constant 0 : index
    %c0_7 = arith.constant 0 : index
    %8 = vector.load %arg10[%c0_6, %c0_7] : memref<256x32xf32, #tpu.memory_space<vmem>>, vector<256x32xf32>
    tpu.vector_store %arg10[%c0_6, %c0_7], %7 {strides = array<i32>} : memref<256x32xf32, #tpu.memory_space<vmem>>, vector<256x32xf32>,
    %c1_i32 = arith.constant 1 : i32
    %9 = arith.cmpi eq, %arg1, %c1_i32 : i32
    %10 = arith.extui %9 : i1 to i32
    %c0_i32_8 = arith.constant 0 : i32
    %11 = arith.cmpi ne, %10, %c0_i32_8 : i32
    scf.if %11 {
      %c0_9 = arith.constant 0 : index
      %c0_10 = arith.constant 0 : index
      %12 = vector.load %arg10[%c0_9, %c0_10] : memref<256x32xf32, #tpu.memory_space<vmem>>, vector<256x32xf32>
      %c0_11 = arith.constant 0 : index
      %c0_12 = arith.constant 0 : index
      %13 = vector.load %arg5[%c0_11, %c0_12] : memref<256x32xf32, #tpu.memory_space<vmem>>, vector<256x32xf32>
      %14 = arith.addf %12, %13 : vector<256x32xf32>
      %cst_13 = arith.constant 5.000000e-01 : f32
      %15 = vector.broadcast %cst_13 : f32 to vector<256x32xf32>
      %16 = arith.mulf %14, %15 : vector<256x32xf32>
      %c0_14 = arith.constant 0 : index
      %c0_15 = arith.constant 0 : index
      %17 = vector.load %arg6[%c0_14, %c0_15] : memref<32x128xf32, #tpu.memory_space<vmem>>, vector<32x128xf32>
      %c0_16 = arith.constant 0 : index
      %c0_17 = arith.constant 0 : index
      %18 = vector.load %arg2[%c0_16, %c0_17] : memref<256x32xf32, #tpu.memory_space<vmem>>, vector<256x32xf32>
      %cst_18 = arith.constant dense<0.000000e+00> : vector<256x128xf32>
      %19 = tpu.matmul %18, %17, %cst_18 {dimension_numbers = #tpu.dot_dimension_numbers<[1], [0], [0], [1], [0, 0, 1, 1], [], []>} : vector<256x32xf32>, vector<32x128xf32>, vector<256x128xf32> -> vector<256x128xf32>
      %cst_19 = arith.constant dense<0.000000e+00> : vector<256x128xf32>
      %20 = tpu.matmul %16, %17, %cst_19 {dimension_numbers = #tpu.dot_dimension_numbers<[1], [0], [0], [1], [0, 0, 1, 1], [], []>} : vector<256x32xf32>, vector<32x128xf32>, vector<256x128xf32> -> vector<256x128xf32>
      %c0_20 = arith.constant 0 : index
      %c0_21 = arith.constant 0 : index
      %21 = vector.load %arg9[%c0_20, %c0_21] : memref<256x128xf32, #tpu.memory_space<vmem>>, vector<256x128xf32>
      tpu.vector_store %arg9[%c0_20, %c0_21], %20 {strides = array<i32>} : memref<256x128xf32, #tpu.memory_space<vmem>>, vector<256x128xf32>,
      %22 = arith.addf %19, %20 : vector<256x128xf32>
      %c0_22 = arith.constant 0 : index
      %c0_23 = arith.constant 0 : index
      %23 = vector.load %arg7[%c0_22, %c0_23] : memref<1x128xf32, #tpu.memory_space<vmem>>, vector<1x128xf32>
      %24 = vector.broadcast %23 : vector<1x128xf32> to vector<256x128xf32>
      %25 = arith.addf %22, %24 : vector<256x128xf32>
      %c0_24 = arith.constant 0 : index
      %c0_25 = arith.constant 0 : index
      %26 = vector.load %arg8[%c0_24, %c0_25] : memref<256x128xf32, #tpu.memory_space<vmem>>, vector<256x128xf32>
      tpu.vector_store %arg8[%c0_24, %c0_25], %25 {strides = array<i32>} : memref<256x128xf32, #tpu.memory_space<vmem>>, vector<256x128xf32>,
    } else {
    }
    return
  }
  func.func @transform_0(%arg0: i32, %arg1: i32) -> (i32, i32) {
    %c0_i32 = arith.constant 0 : i32
    %c0_i32_0 = arith.constant 0 : i32
    return %arg0, %c0_i32 : i32, i32
  }
  func.func @transform_1(%arg0: i32, %arg1: i32) -> (i32, i32) {
    %c0_i32 = arith.constant 0 : i32
    return %arg0, %arg1 : i32, i32
  }
  func.func @transform_2(%arg0: i32, %arg1: i32) -> (i32, i32) {
    %c0_i32 = arith.constant 0 : i32
    %c0_i32_0 = arith.constant 0 : i32
    return %arg1, %c0_i32 : i32, i32
  }
  func.func @transform_3(%arg0: i32, %arg1: i32) -> (i32, i32) {
    %c0_i32 = arith.constant 0 : i32
    %c0_i32_0 = arith.constant 0 : i32
    return %arg0, %c0_i32 : i32, i32
  }
  func.func @transform_4(%arg0: i32, %arg1: i32) -> (i32, i32) {
    %c0_i32 = arith.constant 0 : i32
    %c0_i32_0 = arith.constant 0 : i32
    %c0_i32_1 = arith.constant 0 : i32
    return %c0_i32, %c0_i32_0 : i32, i32
  }
  func.func @transform_5(%arg0: i32, %arg1: i32) -> (i32, i32) {
    %c0_i32 = arith.constant 0 : i32
    %c0_i32_0 = arith.constant 0 : i32
    %c0_i32_1 = arith.constant 0 : i32
    return %c0_i32, %c0_i32_0 : i32, i32
  }
  func.func @transform_6(%arg0: i32, %arg1: i32) -> (i32, i32) {
    %c0_i32 = arith.constant 0 : i32
    %c0_i32_0 = arith.constant 0 : i32
    return %arg0, %c0_i32 : i32, i32
  }
  func.func @transform_7(%arg0: i32, %arg1: i32) -> (i32, i32) {
    %c0_i32 = arith.constant 0 : i32
    %c0_i32_0 = arith.constant 0 : i32
    return %arg0, %c0_i32 : i32, i32
  }
}

</mosaic_0001>

<bundles_post_ra>
// kernel: tpu_custom_call.1
= control target key start
LH: loop header
LB: loop body
LE: loop exit
PB: predicated region body
PF: predicated region fallthrough
CT: control target
= control target key end

     0   :  { %s3406_s0 = inlined_call_operand.vmem [shape: f32[512,32], index: 0, kind: input, shape index: {}]   ;;  %s3407_s1 = inlined_call_operand.hbm [shape: f32[512,512], index: 1, kind: input, shape index: {}]   ;;  %s3408_s2 = inlined_call_operand.vmem [shape: f32[512,32], index: 2, kind: input, shape index: {}]   ;;  %s3409_s3 = inlined_call_operand.vmem [shape: f32[512,32], index: 3, kind: input, shape index: {}]   ;;  %s3410_s4 = inlined_call_operand.vmem [shape: f32[32,128], index: 4, kind: input, shape index: {}]   ;;  %s3411_s5 = inlined_call_operand.vmem [shape: f32[1,128], index: 5, kind: input, shape index: {}]   ;;  %s3412_s6 = inlined_call_operand.hbm [shape: f32[512,128], index: 6, kind: output, shape index: {0}]   ;;  %s3413_s7 = inlined_call_operand.hbm [shape: f32[512,128], index: 7, kind: output, shape index: {1}]  }
   0x1   :  { %3424 = sst [smem:[#allocation19_spill]] %s3406_s0 }
   0x2   :  { %3425 = sst [smem:[#allocation20_spill]] %s3407_s1 }
   0x3   :  { %3426 = sst [smem:[#allocation21_spill]] %s3412_s6 }
   0x4   :  { %3427 = sst [smem:[#allocation22_spill]] %s3413_s7 }
   0x5   :  { %13 = vsyncpa [#allocation4], 0 }
   0x6   :  { %15 = vsyncpa [#allocation4 + $0x1], 0 }
   0x7   :  { %16 = vsyncpa [#allocation5], 0 }
   0x8   :  { %18 = vsyncpa [#allocation5 + $0x1], 0 }
   0x9   :  { %19 = vsyncpa [#allocation8], 0 }
   0xa   :  { %21 = vsyncpa [#allocation8 + $0x1], 0  ;;  %s2680_s24 = smov 0   ;;  %s2682_s25 = smov 0  }
   0xb   :  { %s2684_s26 = smov 0   ;;  %s2686_s27 = smov 0  }
   0xc   :  { %s2688_s28 = smov 0   ;;  %s2690_s29 = smov 0  }
   0xd   :  { %s2692_s30 = smov 0   ;;  %s2694_s8 = smov 0  }
   0xe   :  { %s2696_s9 = smov 0   ;;  %s2698_s10 = smov 0  }
   0xf   :  { %s2700_s11 = smov 0  }
  0x10 LB: > { %3428 = sst [smem:[#allocation12_spill]] %s2608_s29  ;;  %s1953_s12 = sadd.s32 4294967295, %s2628_s11   ;;  %s2628_s11 = sphi %s2700_s11, %s27_s11   ;;  %s2624_s10 = sphi %s2698_s10, %s3454_s10   ;;  %s2620_s9 = sphi %s2696_s9, %s3453_s9   ;;  %s2616_s8 = sphi %s2694_s8, %s3452_s8   ;;  %s2612_s30 = sphi %s2692_s30, %s3451_s30   ;;  %s2608_s29 = sphi %s2690_s29, %s3450_s29   ;;  %s2604_s28 = sphi %s2688_s28, %s3459_s28   ;;  %s2600_s27 = sphi %s2686_s27, %s3458_s27   ;;  %s2596_s26 = sphi %s2684_s26, %s3457_s26   ;;  %s2592_s25 = sphi %s2682_s25, %s3456_s25   ;;  %s2588_s24 = sphi %s2680_s24, %s3455_s24  }
  0x11   : > { %3429 = sst [smem:[#allocation13_spill]] %s2620_s9  ;;  %s1954_s13 = sadd.s32 4294967294, %s2628_s11  }
  0x12   : > { %3430 = sst [smem:[#allocation14_spill]] %s2624_s10  ;;  %s36_s14 = sadd.s32 1, %s2620_s9 }
  0x13   : > { %s39_s15 = sadd.s32 1, %s2624_s10  ;;  %p37_p0 = scmp.ge.s32.totalorder %s36_s14, 2 }
  0x14   : > { %s74_s16 = sadd.s32 1, %s2608_s29  ;;  %p81_p1 = scmp.ne.s32.totalorder %s2608_s29, %s2604_s28 }
  0x15   : > { %p82_p2 = scmp.eq.s32.totalorder %s2628_s11, 0  ;;  %s3461_s14 = smov (%p37_p0, %s36_s14), 0 }
  0x16   : > { %3431 = sst [smem:[#allocation15_spill]] %s3461_s14  ;;  %s3463_s15 = smov (!%p37_p0, %s39_s15), %s2624_s10 }
  0x17   : > { %s70_s17 = ssub.s32 %s2620_s9, %s3461_s14  ;;  %p2746_p3 = por %p82_p2, %p81_p1 }
  0x18   : > { %p41_p4 = scmp.ge.s32.totalorder %s3463_s15, 2  ;;  %p87_p5 = scmp.ne.s32.totalorder %s2604_s28, %s2600_s27 }
  0x19   : > { %p88_p6 = scmp.eq.s32.totalorder %s1953_s12, 0  ;;  %s194_s19 = sadd.s32 1, %s2596_s26 }
  0x1a   : > { %s3465_s15 = smov (%p41_p4, %s3463_s15), 0  ;;  %p204_p8 = scmp.ne.s32.totalorder %s2596_s26, %s2592_s25 }
  0x1b   : > { %3433 = sst [smem:[#allocation16_spill]] %s3465_s15  ;;  %p2754_p7 = por %p88_p6, %p87_p5 }
  0x1c   : > { %s69_s21 = ssub.s32 %s2624_s10, %s3465_s15  ;;  %p205_p9 = scmp.eq.s32.totalorder %s1953_s12, 3 }
  0x1d   : > { %s71_s22 = sor.u32 %s70_s17, %s69_s21  ;;  %p192_p10 = scmp.eq.s32.totalorder %s69_s21, 0 }
  0x1e   : > { %p72_p11 = scmp.eq.s32.totalorder %s71_s22, 0  ;;  %p2762_p12 = por %p205_p9, %p204_p8 }
  0x1f   : > { %s2767_s27 = scalar_select %p192_p10, %s2596_s26, %s194_s19  }
  0x20   : > { %s3435_s23 = scalar_select %p2762_p12, 1, 0 }
  0x21   : > { %s2770_s14 = scalar_select %p72_p11, %s2608_s29, %s74_s16  }
  0x22   : > { %3436 = sst [smem:[#allocation17_spill]] %s3435_s23  ;;  %p210_p13 = scmp.ne.s32.totalorder %s2592_s25, %s2588_s24 }
  0x23   : > { %3437 = sst [smem:[#allocation18_spill]] %s2770_s14  ;;  %p211_p0 = scmp.eq.s32.totalorder %s1954_s13, 3 }
  0x24   : > { %p2347_p1 = scmp.lt.s32.totalorder %s2628_s11, 4  ;;  %s272_s12 = sand.u32 1, %s2608_s29  }
  0x25   : > { %p2775_p2 = por %p211_p0, %p210_p13  ;;  %s1957_s17 = sshll.u32 %s272_s12, 9 }
  0x26   : > { %s1959_s21 = sshll.u32 %s2620_s9, 1  ;;  %s2047_s22 = sshll.u32 %s2624_s10, 7 }
  0x27   : > { %s3438_s7 = scalar_select %p2775_p2, 1, 0 }
  0x28   : > { %s276_s15 = scalar_lea.vmem [#allocation3], %s1957_s17  ;;  %s283_s23 = sadd.s32 %s2047_s22, %s1959_s21 }
  0x29   : > { %s286_s6 = sshll.u32 %s276_s15, 4  ;;  %s1961_s19 = sshll.u32 %s283_s23, 7  ;;  %s2782_s6 = int_to_ptr.vmem [resolvable:$true] %s286_s6 }
  0x2a   : > { %p2786_p4 = pnand %p2347_p1, %p2746_p3  ;;  %s3440_s1 = sld [smem:[#allocation20_spill]] }
  0x2b   : > { %s2796_s15 = scalar_lea.sflag [#allocation4], %s272_s12 }
  0x2c   : > { %p2446_p3 = pneg %p2786_p4 }
  0x30   : > { %s2793_s29 = scalar_lea.hbm %s3440_s1, %s1961_s19  ;;  %s2449_s17 = scalar_lea.hbm %s3440_s1, 32768 }
  0x31   : > { %s2444_s23 = scalar_lea.hbm %s2793_s29, 8192  ;;  %p2450_p10 = scmp.lt.u32.totalorder %s2793_s29, %s3440_s1 }
  0x32   : > { %p2445_p6 = scmp.ne.s32.totalorder %s2793_s29, %s2444_s23  ;;  %p2451_p11 = scmp.lt.u32.totalorder %s2449_s17, %s2444_s23 }
  0x33   : > { %p2453_p0 = scmp.lt.u32.totalorder %s2444_s23, %s2793_s29 }
  0x34   : > { %p2447_p8 = pnand %p2446_p3, %p2445_p6  ;;  %p2452_p13 = por %p2451_p11, %p2450_p10 }
  0x36   : > { %p2448_p9 = pneg %p2447_p8  ;;  %p2454_p1 = por %p2453_p0, %p2452_p13 }
  0x38   : > { %p2455_p5 = pnand %p2454_p1, %p2448_p9 }
  0x3a   : > { %2458 = shalt.err (!%p2455_p5)
}
  0x3b   : > { %s2459_s12 = scalar_lea.vmem %s2782_s6, 8192  ;;  %s2630_s19 = smov [#allocation3]  }
  0x3c   : > { %p2460_p6 = scmp.ne.s32.totalorder %s2782_s6, %s2459_s12  ;;  %s2464_s13 = sshll.u32 %s2630_s19, 4  ;;  %s2465_s13 = int_to_ptr.vmem [resolvable:$false] %s2464_s13 }
  0x3d   : > { %s2466_s14 = scalar_lea.vmem %s2465_s13, 16384  ;;  %p2467_p12 = scmp.lt.s32.totalorder %s2782_s6, %s2465_s13 }
  0x3e   : > { %p2462_p8 = pnand %p2460_p6, %p2446_p3  ;;  %p2468_p10 = scmp.lt.s32.totalorder %s2466_s14, %s2459_s12 }
  0x40   : > { %p2463_p2 = pneg %p2462_p8  ;;  %p2469_p11 = por %p2468_p10, %p2467_p12 }
  0x42   : > { %p2470_p13 = pnand %p2469_p11, %p2463_p2 }
  0x44   : > { %2473 = shalt.err (!%p2470_p13)
}
  0x45   : > { %s2631_s23 = smov 512   ;;  %s2632_s18 = smov 256  }
  0x46   : > { %s2633_s17 = smov 16   ;;  %p312_p5 = scmp.lt.s32.totalorder %s2628_s11, 5 }
  0x47   : > { %2339 = dma.hbm_to_vmem [thread:$0]  (!%p2786_p4), %s2793_s29, 8192, %s2782_s6, %s2796_s15, %s2631_s23, %s2632_s18, %s2633_s17  }
  0x48   : > { %p3441_p3 = scmp.ge.s32.totalorder %s2628_s11, 1 }
  0x4a   : > { %p313_p9 = pnand %p3441_p3, %p312_p5 }
  0x4b   : > { %s318_s21 = sand.u32 (!%p313_p9), 1, %s2604_s28  }
  0x4c   : > { %316 = sbr.rel (%p313_p9) target bundleno = 765 (0x2fd), region = 44  ;;  %s1963_s22 = sshll.u32 (!%p313_p9), %s318_s21, 9 }
  0x4d   : > { %s319_s12 = scalar_lea.sflag (!%p313_p9), [#allocation4], %s318_s21  ;;  %s2828_s19 = scalar_lea.vmem (!%p313_p9), [#allocation3], %s1963_s22 }
  0x53   : > { %2575 = dma.done.wait (%p2754_p7), %s319_s12, 8192  }
  0x54   : > { %2577 = vsyncadd (%p2754_p7), %s319_s12, 4294959104  ;;  %s2835_s6 = sand.u32 1, %s2592_s25   ;;  %s1966_s29 = sshll.u32 %s2616_s8, 5 }
  0x55   : > { %s1964_s16 = sshll.u32 %s2835_s6, 8  ;;  %p374_p12 = scmp.lt.s32.totalorder %s1966_s29, 63 }
  0x56   : > { %s1968_s15 = sshll.u32 %s2612_s30, 5  ;;  %s3442_s0 = sld [smem:[#allocation19_spill]] }
  0x57   : > { %s3467_s29 = smov (!%p374_p12, %s1966_s29), 63  ;;  %p382_p2 = scmp.lt.s32.totalorder %s1968_s15, 63 }
  0x58   : > { %s1967_s13 = sshll.u32 %s3467_s29, 3  ;;  %s2855_s9 = scalar_lea.vmem [#allocation6], %s1964_s16 }
  0x59   : > { %s2848_s21 = scalar_lea.vmem %s3409_s3, %s1967_s13  ;;  %s3469_s15 = smov (!%p382_p2, %s1968_s15), 63 }
  0x5a   : > { %s1969_s22 = sshll.u32 %s3469_s15, 3  ;;  %s2857_s29 = scalar_lea.vmem [#allocation7], %s1964_s16 }
  0x5b   : > { %s2853_s10 = scalar_lea.vmem %s3408_s2, %s1969_s22  ;;  %p1972_p7 = scmp.ne.s32.totalorder %s2612_s30, 0 }
  0x5c   : > { %s2843_s18 = scalar_lea.vmem %s3442_s0, %s1967_s13  ;;  %vm399_vm0 = vcmask (!%p1972_p7), 261120   ;;  %v2634_v0 = vmov (!%p1972_p7), 0.0  }
  0x5d   : > { %398 = sbr.rel (%p1972_p7) target bundleno = 109 (0x6d), region = 52  ;;  %400 = vst.msk [vmem:[#allocation2] sm:$0xff] (!%p1972_p7), %vm399_vm0, %v2634_v0  ;;  %401 = vst.msk [vmem:[#allocation2 + $0x8] sm:$0xff] (!%p1972_p7), %vm399_vm0, %v2634_v0 }
  0x5e   : > { %402 = vst.msk [vmem:[#allocation2 + $0x10] sm:$0xff] (!%p1972_p7), %vm399_vm0, %v2634_v0  ;;  %403 = vst.msk [vmem:[#allocation2 + $0x18] sm:$0xff] (!%p1972_p7), %vm399_vm0, %v2634_v0 }
  0x5f   : > { %404 = vst.msk [vmem:[#allocation2 + $0x20] sm:$0xff] (!%p1972_p7), %vm399_vm0, %v2634_v0  ;;  %405 = vst.msk [vmem:[#allocation2 + $0x28] sm:$0xff] (!%p1972_p7), %vm399_vm0, %v2634_v0 }
  0x60   : > { %406 = vst.msk [vmem:[#allocation2 + $0x30] sm:$0xff] (!%p1972_p7), %vm399_vm0, %v2634_v0  ;;  %407 = vst.msk [vmem:[#allocation2 + $0x38] sm:$0xff] (!%p1972_p7), %vm399_vm0, %v2634_v0 }
  0x61   : > { %408 = vst.msk [vmem:[#allocation2 + $0x40] sm:$0xff] (!%p1972_p7), %vm399_vm0, %v2634_v0  ;;  %409 = vst.msk [vmem:[#allocation2 + $0x48] sm:$0xff] (!%p1972_p7), %vm399_vm0, %v2634_v0 }
  0x62   : > { %410 = vst.msk [vmem:[#allocation2 + $0x50] sm:$0xff] (!%p1972_p7), %vm399_vm0, %v2634_v0  ;;  %411 = vst.msk [vmem:[#allocation2 + $0x58] sm:$0xff] (!%p1972_p7), %vm399_vm0, %v2634_v0 }
  0x63   : > { %412 = vst.msk [vmem:[#allocation2 + $0x60] sm:$0xff] (!%p1972_p7), %vm399_vm0, %v2634_v0  ;;  %413 = vst.msk [vmem:[#allocation2 + $0x68] sm:$0xff] (!%p1972_p7), %vm399_vm0, %v2634_v0 }
  0x64   : > { %414 = vst.msk [vmem:[#allocation2 + $0x70] sm:$0xff] %vm399_vm0, %v2634_v0  ;;  %415 = vst.msk [vmem:[#allocation2 + $0x78] sm:$0xff] %vm399_vm0, %v2634_v0 }
  0x65   : > { %416 = vst.msk [vmem:[#allocation2 + $0x80] sm:$0xff] %vm399_vm0, %v2634_v0  ;;  %417 = vst.msk [vmem:[#allocation2 + $0x88] sm:$0xff] %vm399_vm0, %v2634_v0 }
  0x66   : > { %418 = vst.msk [vmem:[#allocation2 + $0x90] sm:$0xff] %vm399_vm0, %v2634_v0  ;;  %419 = vst.msk [vmem:[#allocation2 + $0x98] sm:$0xff] %vm399_vm0, %v2634_v0 }
  0x67   : > { %420 = vst.msk [vmem:[#allocation2 + $0xa0] sm:$0xff] %vm399_vm0, %v2634_v0  ;;  %421 = vst.msk [vmem:[#allocation2 + $0xa8] sm:$0xff] %vm399_vm0, %v2634_v0 }
  0x68   : > { %422 = vst.msk [vmem:[#allocation2 + $0xb0] sm:$0xff] %vm399_vm0, %v2634_v0  ;;  %423 = vst.msk [vmem:[#allocation2 + $0xb8] sm:$0xff] %vm399_vm0, %v2634_v0 }
  0x69   : > { %424 = vst.msk [vmem:[#allocation2 + $0xc0] sm:$0xff] %vm399_vm0, %v2634_v0  ;;  %425 = vst.msk [vmem:[#allocation2 + $0xc8] sm:$0xff] %vm399_vm0, %v2634_v0 }
  0x6a   : > { %426 = vst.msk [vmem:[#allocation2 + $0xd0] sm:$0xff] %vm399_vm0, %v2634_v0  ;;  %427 = vst.msk [vmem:[#allocation2 + $0xd8] sm:$0xff] %vm399_vm0, %v2634_v0 }
  0x6b   : > { %428 = vst.msk [vmem:[#allocation2 + $0xe0] sm:$0xff] %vm399_vm0, %v2634_v0  ;;  %429 = vst.msk [vmem:[#allocation2 + $0xe8] sm:$0xff] %vm399_vm0, %v2634_v0 }
  0x6c   : > { %430 = vst.msk [vmem:[#allocation2 + $0xf0] sm:$0xff] %vm399_vm0, %v2634_v0  ;;  %431 = vst.msk [vmem:[#allocation2 + $0xf8] sm:$0xff] %vm399_vm0, %v2634_v0 }
  0x6d PF: > { %v528_v1 = vld [vmem:[%s2853_s10] sm:$0xff]  ;;  %v529_v2 = vld [vmem:[%s2853_s10 + $0x8] sm:$0xff]  ;;  %v530_v3 = vld [vmem:[%s2853_s10 + $0x10] sm:$0xff]  ;;  %v2635_v4 = vmov 0.0|0.0   ;;  %vm817_vm1 = vcmask 261120   ;;  %p1973_p4 = scmp.ne.s32.totalorder %s2612_s30, 1 }
  0x6e   : > { %2234 = vmatprep.subr.bf16.mxu0 %v2635_v4  ;;  %2298 = vmatprep.subr.bf16.mxu1 %v2635_v4  ;;  %v2235_v5 = vpack.c.bf16 %v529_v2, %v528_v1  ;;  %v531_v6 = vld [vmem:[%s2853_s10 + $0x18] sm:$0xff]  ;;  %v532_v8 = vld [vmem:[%s2853_s10 + $0x20] sm:$0xff]  ;;  %v533_v9 = vld [vmem:[%s2853_s10 + $0x28] sm:$0xff] }
  0x6f   : > { %v2238_v7 = vpack.c.bf16 %v531_v6, %v530_v3  ;;  %v2241_v10 = vpack.c.bf16 %v533_v9, %v532_v8  ;;  %v534_v11 = vld [vmem:[%s2853_s10 + $0x30] sm:$0xff]  ;;  %v535_v12 = vld [vmem:[%s2853_s10 + $0x38] sm:$0xff]  ;;  %v465_v13 = vld [vmem:[%s2828_s19 + $0x8] sm:$0xff] }
  0x70   : > { %2236 = vmatpush1.bf16.msra.mxu0 %v2235_v5  ;;  %2314 = vmatpush1.bf16.msra.mxu1 %v2235_v5  ;;  %v2244_v14 = vpack.c.bf16 %v535_v12, %v534_v11  ;;  %v497_v15 = vld [vmem:[%s2828_s19 + $0x108] sm:$0xff]  ;;  %v536_v16 = vld [vmem:[%s2853_s10 + $0x40] sm:$0xff]  ;;  %v538_v19 = vld [vmem:[%s2853_s10 + $0x50] sm:$0xff] }
  0x71   : > { %2237 = vmatprep.subr.bf16.mxu0 %v2635_v4  ;;  %2299 = vmatprep.subr.bf16.mxu1 %v2635_v4  ;;  %v537_v17 = vld [vmem:[%s2853_s10 + $0x48] sm:$0xff]  ;;  %v539_v20 = vld [vmem:[%s2853_s10 + $0x58] sm:$0xff]  ;;  %v540_v22 = vld [vmem:[%s2853_s10 + $0x60] sm:$0xff] }
  0x72   : > { %624 = vmatprep.mubr.f32.mxu0 %v465_v13  ;;  %704 = vmatprep.mubr.f32.mxu1 %v497_v15  ;;  %v2247_v18 = vpack.c.bf16 %v537_v17, %v536_v16  ;;  %v2250_v21 = vpack.c.bf16 %v539_v20, %v538_v19  ;;  %v541_v23 = vld [vmem:[%s2853_s10 + $0x68] sm:$0xff]  ;;  %v542_v25 = vld [vmem:[%s2853_s10 + $0x70] sm:$0xff]  ;;  %v543_v26 = vld [vmem:[%s2853_s10 + $0x78] sm:$0xff] }
  0x73   : > { %v2253_v24 = vpack.c.bf16 %v541_v23, %v540_v22  ;;  %v2256_v27 = vpack.c.bf16 %v543_v26, %v542_v25  ;;  %v544_v28 = vld [vmem:[%s2853_s10 + $0x80] sm:$0xff]  ;;  %v545_v29 = vld [vmem:[%s2853_s10 + $0x88] sm:$0xff]  ;;  %v546_v31 = vld [vmem:[%s2853_s10 + $0x90] sm:$0xff] }
  0x74   : > { %2239 = vmatpush1.bf16.msra.mxu0 %v2238_v7  ;;  %2315 = vmatpush1.bf16.msra.mxu1 %v2238_v7  ;;  %v2259_v30 = vpack.c.bf16 %v545_v29, %v544_v28  ;;  %v547_v32 = vld [vmem:[%s2853_s10 + $0x98] sm:$0xff]  ;;  %v548_v34 = vld [vmem:[%s2853_s10 + $0xa0] sm:$0xff]  ;;  %v549_v35 = vld [vmem:[%s2853_s10 + $0xa8] sm:$0xff] }
  0x75   : > { %2240 = vmatprep.subr.bf16.mxu0 %v2635_v4  ;;  %2300 = vmatprep.subr.bf16.mxu1 %v2635_v4  ;;  %v2262_v33 = vpack.c.bf16 %v547_v32, %v546_v31  ;;  %v2265_v36 = vpack.c.bf16 %v549_v35, %v548_v34  ;;  %v550_v37 = vld [vmem:[%s2853_s10 + $0xb0] sm:$0xff]  ;;  %v551_v38 = vld [vmem:[%s2853_s10 + $0xb8] sm:$0xff]  ;;  %v552_v40 = vld [vmem:[%s2853_s10 + $0xc0] sm:$0xff] }
  0x76   : > { %v2268_v39 = vpack.c.bf16 %v551_v38, %v550_v37  ;;  %v553_v41 = vld [vmem:[%s2853_s10 + $0xc8] sm:$0xff]  ;;  %v554_v43 = vld [vmem:[%s2853_s10 + $0xd0] sm:$0xff]  ;;  %v555_v44 = vld [vmem:[%s2853_s10 + $0xd8] sm:$0xff] }
  0x77   : > { %v2271_v42 = vpack.c.bf16 %v553_v41, %v552_v40  ;;  %v2274_v45 = vpack.c.bf16 %v555_v44, %v554_v43  ;;  %v556_v46 = vld [vmem:[%s2853_s10 + $0xe0] sm:$0xff]  ;;  %v557_v47 = vld [vmem:[%s2853_s10 + $0xe8] sm:$0xff]  ;;  %v558_v49 = vld [vmem:[%s2853_s10 + $0xf0] sm:$0xff] }
  0x78   : > { %2242 = vmatpush1.bf16.msra.mxu0 %v2241_v10  ;;  %2316 = vmatpush1.bf16.msra.mxu1 %v2241_v10  ;;  %v2277_v48 = vpack.c.bf16 %v557_v47, %v556_v46  ;;  %v559_v50 = vld [vmem:[%s2853_s10 + $0xf8] sm:$0xff]  ;;  %v464_v52 = vld [vmem:[%s2828_s19] sm:$0xff]  ;;  %v466_v56 = vld [vmem:[%s2828_s19 + $0x10] sm:$0xff] }
  0x79   : > { %2243 = vmatprep.subr.bf16.mxu0 %v2635_v4  ;;  %2301 = vmatprep.subr.bf16.mxu1 %v2635_v4  ;;  %v2280_v51 = vpack.c.bf16 %v559_v50, %v558_v49  ;;  %v496_v53 = vld [vmem:[%s2828_s19 + $0x100] sm:$0xff]  ;;  %v467_v54 = vld [vmem:[%s2828_s19 + $0x18] sm:$0xff]  ;;  %v498_v57 = vld [vmem:[%s2828_s19 + $0x110] sm:$0xff] }
  0x7a   : > { %v499_v55 = vld [vmem:[%s2828_s19 + $0x118] sm:$0xff]  ;;  %v469_v58 = vld [vmem:[%s2828_s19 + $0x28] sm:$0xff]  ;;  %v468_v60 = vld [vmem:[%s2828_s19 + $0x20] sm:$0xff] }
  0x7b   : > { %v501_v59 = vld [vmem:[%s2828_s19 + $0x128] sm:$0xff]  ;;  %v500_v61 = vld [vmem:[%s2828_s19 + $0x120] sm:$0xff]  ;;  %v471_v62 = vld [vmem:[%s2828_s19 + $0x38] sm:$0xff] }
  0x7c   : > { %2245 = vmatpush1.bf16.msra.mxu0 %v2244_v14  ;;  %2317 = vmatpush1.bf16.msra.mxu1 %v2244_v14  ;;  %v503_v63 = vld [vmem:[%s2828_s19 + $0x138] sm:$0xff]  ;;  %v470_v0 = vld [vmem:[%s2828_s19 + $0x30] sm:$0xff]  ;;  %v473_v2 = vld [vmem:[%s2828_s19 + $0x48] sm:$0xff] }
  0x7d   : > { %2246 = vmatprep.subr.bf16.mxu0 %v2635_v4  ;;  %2302 = vmatprep.subr.bf16.mxu1 %v2635_v4  ;;  %v502_v1 = vld [vmem:[%s2828_s19 + $0x130] sm:$0xff]  ;;  %v505_v3 = vld [vmem:[%s2828_s19 + $0x148] sm:$0xff]  ;;  %v504_v5 = vld [vmem:[%s2828_s19 + $0x140] sm:$0xff] }
  0x7e   : > { %v475_v6 = vld [vmem:[%s2828_s19 + $0x58] sm:$0xff]  ;;  %v474_v8 = vld [vmem:[%s2828_s19 + $0x50] sm:$0xff]  ;;  %v477_v10 = vld [vmem:[%s2828_s19 + $0x68] sm:$0xff] }
  0x7f   : > { %v507_v7 = vld [vmem:[%s2828_s19 + $0x158] sm:$0xff]  ;;  %v506_v9 = vld [vmem:[%s2828_s19 + $0x150] sm:$0xff]  ;;  %v509_v11 = vld [vmem:[%s2828_s19 + $0x168] sm:$0xff] }
  0x80   : > { %2248 = vmatpush1.bf16.msra.mxu0 %v2247_v18  ;;  %2318 = vmatpush1.bf16.msra.mxu1 %v2247_v18  ;;  %v476_v12 = vld [vmem:[%s2828_s19 + $0x60] sm:$0xff]  ;;  %v479_v14 = vld [vmem:[%s2828_s19 + $0x78] sm:$0xff]  ;;  %v478_v16 = vld [vmem:[%s2828_s19 + $0x70] sm:$0xff] }
  0x81   : > { %2249 = vmatprep.subr.bf16.mxu0 %v2635_v4  ;;  %2303 = vmatprep.subr.bf16.mxu1 %v2635_v4  ;;  %v508_v13 = vld [vmem:[%s2828_s19 + $0x160] sm:$0xff]  ;;  %v511_v15 = vld [vmem:[%s2828_s19 + $0x178] sm:$0xff]  ;;  %v510_v17 = vld [vmem:[%s2828_s19 + $0x170] sm:$0xff] }
  0x82   : > { %v481_v18 = vld [vmem:[%s2828_s19 + $0x88] sm:$0xff]  ;;  %v480_v20 = vld [vmem:[%s2828_s19 + $0x80] sm:$0xff]  ;;  %v483_v22 = vld [vmem:[%s2828_s19 + $0x98] sm:$0xff] }
  0x83   : > { %v513_v19 = vld [vmem:[%s2828_s19 + $0x188] sm:$0xff]  ;;  %v515_v23 = vld [vmem:[%s2828_s19 + $0x198] sm:$0xff]  ;;  %v514_v25 = vld [vmem:[%s2828_s19 + $0x190] sm:$0xff] }
  0x84   : > { %2251 = vmatpush1.bf16.msra.mxu0 %v2250_v21  ;;  %2319 = vmatpush1.bf16.msra.mxu1 %v2250_v21  ;;  %v512_v21 = vld [vmem:[%s2828_s19 + $0x180] sm:$0xff]  ;;  %v485_v26 = vld [vmem:[%s2828_s19 + $0xa8] sm:$0xff]  ;;  %v519_v31 = vld [vmem:[%s2828_s19 + $0x1b8] sm:$0xff] }
  0x85   : > { %2252 = vmatprep.subr.bf16.mxu0 %v2635_v4  ;;  %2304 = vmatprep.subr.bf16.mxu1 %v2635_v4  ;;  %v484_v28 = vld [vmem:[%s2828_s19 + $0xa0] sm:$0xff]  ;;  %v486_v32 = vld [vmem:[%s2828_s19 + $0xb0] sm:$0xff]  ;;  %v489_v34 = vld [vmem:[%s2828_s19 + $0xc8] sm:$0xff] }
  0x86   : > { %v516_v29 = vld [vmem:[%s2828_s19 + $0x1a0] sm:$0xff]  ;;  %v521_v35 = vld [vmem:[%s2828_s19 + $0x1c8] sm:$0xff]  ;;  %v491_v38 = vld [vmem:[%s2828_s19 + $0xd8] sm:$0xff] }
  0x87   : > { %v520_v37 = vld [vmem:[%s2828_s19 + $0x1c0] sm:$0xff]  ;;  %v490_v40 = vld [vmem:[%s2828_s19 + $0xd0] sm:$0xff]  ;;  %v525_v43 = vld [vmem:[%s2828_s19 + $0x1e8] sm:$0xff] }
  0x88   : > { %2254 = vmatpush1.bf16.msra.mxu0 %v2253_v24  ;;  %2320 = vmatpush1.bf16.msra.mxu1 %v2253_v24  ;;  %v482_v24 = vld [vmem:[%s2828_s19 + $0x90] sm:$0xff]  ;;  %v492_v44 = vld [vmem:[%s2828_s19 + $0xe0] sm:$0xff]  ;;  %v495_v46 = vld [vmem:[%s2828_s19 + $0xf8] sm:$0xff] }
  0x89   : > { %2255 = vmatprep.subr.bf16.mxu0 %v2635_v4  ;;  %2305 = vmatprep.subr.bf16.mxu1 %v2635_v4  ;;  %v522_v41 = vld [vmem:[%s2828_s19 + $0x1d0] sm:$0xff]  ;;  %v527_v47 = vld [vmem:[%s2828_s19 + $0x1f8] sm:$0xff]  ;;  %v432_v50 = vld [vmem:[#allocation2] sm:$0xff] }
  0x8a   : > { %v526_v49 = vld [vmem:[%s2828_s19 + $0x1f0] sm:$0xff] }
  0x8c   : > { %2257 = vmatpush1.bf16.msra.mxu0 %v2256_v27  ;;  %2321 = vmatpush1.bf16.msra.mxu1 %v2256_v27  ;;  %v517_v27 = vld [vmem:[%s2828_s19 + $0x1a8] sm:$0xff] }
  0x8d   : > { %2258 = vmatprep.subr.bf16.mxu0 %v2635_v4  ;;  %2306 = vmatprep.subr.bf16.mxu1 %v2635_v4 }
  0x90   : > { %2260 = vmatpush1.bf16.msra.mxu0 %v2259_v30  ;;  %2322 = vmatpush1.bf16.msra.mxu1 %v2259_v30  ;;  %v487_v30 = vld [vmem:[%s2828_s19 + $0xb8] sm:$0xff] }
  0x91   : > { %2261 = vmatprep.subr.bf16.mxu0 %v2635_v4  ;;  %2307 = vmatprep.subr.bf16.mxu1 %v2635_v4 }
  0x94   : > { %2263 = vmatpush1.bf16.msra.mxu0 %v2262_v33  ;;  %2323 = vmatpush1.bf16.msra.mxu1 %v2262_v33  ;;  %v518_v33 = vld [vmem:[%s2828_s19 + $0x1b0] sm:$0xff] }
  0x95   : > { %2264 = vmatprep.subr.bf16.mxu0 %v2635_v4  ;;  %2308 = vmatprep.subr.bf16.mxu1 %v2635_v4 }
  0x98   : > { %2266 = vmatpush1.bf16.msra.mxu0 %v2265_v36  ;;  %2324 = vmatpush1.bf16.msra.mxu1 %v2265_v36  ;;  %v488_v36 = vld [vmem:[%s2828_s19 + $0xc0] sm:$0xff] }
  0x99   : > { %2267 = vmatprep.subr.bf16.mxu0 %v2635_v4  ;;  %2309 = vmatprep.subr.bf16.mxu1 %v2635_v4 }
  0x9c   : > { %2269 = vmatpush1.bf16.msra.mxu0 %v2268_v39  ;;  %2325 = vmatpush1.bf16.msra.mxu1 %v2268_v39  ;;  %v523_v39 = vld [vmem:[%s2828_s19 + $0x1d8] sm:$0xff] }
  0x9d   : > { %2270 = vmatprep.subr.bf16.mxu0 %v2635_v4  ;;  %2310 = vmatprep.subr.bf16.mxu1 %v2635_v4 }
  0xa0   : > { %2272 = vmatpush1.bf16.msra.mxu0 %v2271_v42  ;;  %2326 = vmatpush1.bf16.msra.mxu1 %v2271_v42  ;;  %v493_v42 = vld [vmem:[%s2828_s19 + $0xe8] sm:$0xff] }
  0xa1   : > { %2273 = vmatprep.subr.bf16.mxu0 %v2635_v4  ;;  %2311 = vmatprep.subr.bf16.mxu1 %v2635_v4 }
  0xa4   : > { %2275 = vmatpush1.bf16.msra.mxu0 %v2274_v45  ;;  %2327 = vmatpush1.bf16.msra.mxu1 %v2274_v45  ;;  %v524_v45 = vld [vmem:[%s2828_s19 + $0x1e0] sm:$0xff] }
  0xa5   : > { %2276 = vmatprep.subr.bf16.mxu0 %v2635_v4  ;;  %2312 = vmatprep.subr.bf16.mxu1 %v2635_v4 }
  0xa8   : > { %2278 = vmatpush1.bf16.msra.mxu0 %v2277_v48  ;;  %2328 = vmatpush1.bf16.msra.mxu1 %v2277_v48  ;;  %v494_v48 = vld [vmem:[%s2828_s19 + $0xf0] sm:$0xff] }
  0xa9   : > { %2279 = vmatprep.subr.bf16.mxu0 %v2635_v4  ;;  %2313 = vmatprep.subr.bf16.mxu1 %v2635_v4  ;;  %v472_v4 = vld [vmem:[%s2828_s19 + $0x40] sm:$0xff] }
  0xac   : > { %2281 = vmatpush1.bf16.msra.mxu0 %v2280_v51  ;;  %2329 = vmatpush1.bf16.msra.mxu1 %v2280_v51  ;;  %v448_v51 = vld [vmem:[#allocation2 + $0x80] sm:$0xff] }
  0xaf   : > { %625 = vmatmul.mubr.f32.vlgmr.msra.gmra.mrb[0].mxu0 %v464_v52  ;;  %705 = vmatmul.mubr.f32.vlgmr.msra.gmra.mrb[0].mxu1 %v496_v53 }
  0xb0   : > { %629 = vmatprep.mubr.f32.mxu0 %v467_v54  ;;  %709 = vmatprep.mubr.f32.mxu1 %v499_v55 }
  0xb3   : > { %630 = vmatmul.mubr.f32.gmra.mrb[2].mxu0 %v466_v56  ;;  %710 = vmatmul.mubr.f32.gmra.mrb[2].mxu1 %v498_v57 }
  0xb4   : > { %634 = vmatprep.mubr.f32.mxu0 %v469_v58  ;;  %714 = vmatprep.mubr.f32.mxu1 %v501_v59  ;;  %v433_v58 = vld [vmem:[#allocation2 + $0x8] sm:$0xff] }
  0xb5   : > { %v449_v59 = vld [vmem:[#allocation2 + $0x88] sm:$0xff] }
  0xb7   : > { %635 = vmatmul.mubr.f32.gmra.mrb[4].mxu0 %v468_v60  ;;  %715 = vmatmul.mubr.f32.gmra.mrb[4].mxu1 %v500_v61 }
  0xb8   : > { %639 = vmatprep.mubr.f32.mxu0 %v471_v62  ;;  %719 = vmatprep.mubr.f32.mxu1 %v503_v63 }
  0xbb   : > { %640 = vmatmul.mubr.f32.gmra.mrb[6].mxu0 %v470_v0  ;;  %720 = vmatmul.mubr.f32.gmra.mrb[6].mxu1 %v502_v1 }
  0xbc   : > { %644 = vmatprep.mubr.f32.mxu0 %v473_v2  ;;  %724 = vmatprep.mubr.f32.mxu1 %v505_v3  ;;  %v434_v2 = vld [vmem:[#allocation2 + $0x10] sm:$0xff] }
  0xbd   : > { %v450_v3 = vld [vmem:[#allocation2 + $0x90] sm:$0xff] }
  0xbf   : > { %645 = vmatmul.mubr.f32.gmra.mrb[8].mxu0 %v472_v4  ;;  %725 = vmatmul.mubr.f32.gmra.mrb[8].mxu1 %v504_v5 }
  0xc0   : > { %649 = vmatprep.mubr.f32.mxu0 %v475_v6  ;;  %729 = vmatprep.mubr.f32.mxu1 %v507_v7 }
  0xc3   : > { %650 = vmatmul.mubr.f32.gmra.mrb[10].mxu0 %v474_v8  ;;  %730 = vmatmul.mubr.f32.gmra.mrb[10].mxu1 %v506_v9 }
  0xc4   : > { %654 = vmatprep.mubr.f32.mxu0 %v477_v10  ;;  %734 = vmatprep.mubr.f32.mxu1 %v509_v11  ;;  %v435_v10 = vld [vmem:[#allocation2 + $0x18] sm:$0xff] }
  0xc5   : > { %v451_v11 = vld [vmem:[#allocation2 + $0x98] sm:$0xff] }
  0xc7   : > { %655 = vmatmul.mubr.f32.gmra.mrb[12].mxu0 %v476_v12  ;;  %735 = vmatmul.mubr.f32.gmra.mrb[12].mxu1 %v508_v13 }
  0xc8   : > { %659 = vmatprep.mubr.f32.mxu0 %v479_v14  ;;  %739 = vmatprep.mubr.f32.mxu1 %v511_v15 }
  0xcb   : > { %660 = vmatmul.mubr.f32.gmra.mrb[14].mxu0 %v478_v16  ;;  %740 = vmatmul.mubr.f32.gmra.mrb[14].mxu1 %v510_v17 }
  0xcc   : > { %664 = vmatprep.mubr.f32.mxu0 %v481_v18  ;;  %744 = vmatprep.mubr.f32.mxu1 %v513_v19  ;;  %v436_v18 = vld [vmem:[#allocation2 + $0x20] sm:$0xff] }
  0xcd   : > { %v452_v19 = vld [vmem:[#allocation2 + $0xa0] sm:$0xff] }
  0xcf   : > { %665 = vmatmul.mubr.f32.gmra.mrb[16].mxu0 %v480_v20  ;;  %745 = vmatmul.mubr.f32.gmra.mrb[16].mxu1 %v512_v21 }
  0xd0   : > { %669 = vmatprep.mubr.f32.mxu0 %v483_v22  ;;  %749 = vmatprep.mubr.f32.mxu1 %v515_v23 }
  0xd3   : > { %670 = vmatmul.mubr.f32.gmra.mrb[18].mxu0 %v482_v24  ;;  %750 = vmatmul.mubr.f32.gmra.mrb[18].mxu1 %v514_v25 }
  0xd4   : > { %674 = vmatprep.mubr.f32.mxu0 %v485_v26  ;;  %754 = vmatprep.mubr.f32.mxu1 %v517_v27  ;;  %v437_v26 = vld [vmem:[#allocation2 + $0x28] sm:$0xff] }
  0xd5   : > { %v453_v27 = vld [vmem:[#allocation2 + $0xa8] sm:$0xff] }
  0xd7   : > { %675 = vmatmul.mubr.f32.gmra.mrb[20].mxu0 %v484_v28  ;;  %755 = vmatmul.mubr.f32.gmra.mrb[20].mxu1 %v516_v29 }
  0xd8   : > { %679 = vmatprep.mubr.f32.mxu0 %v487_v30  ;;  %759 = vmatprep.mubr.f32.mxu1 %v519_v31 }
  0xdb   : > { %680 = vmatmul.mubr.f32.gmra.mrb[22].mxu0 %v486_v32  ;;  %760 = vmatmul.mubr.f32.gmra.mrb[22].mxu1 %v518_v33 }
  0xdc   : > { %684 = vmatprep.mubr.f32.mxu0 %v489_v34  ;;  %764 = vmatprep.mubr.f32.mxu1 %v521_v35  ;;  %v438_v34 = vld [vmem:[#allocation2 + $0x30] sm:$0xff] }
  0xdd   : > { %v454_v35 = vld [vmem:[#allocation2 + $0xb0] sm:$0xff] }
  0xdf   : > { %685 = vmatmul.mubr.f32.gmra.mrb[24].mxu0 %v488_v36  ;;  %765 = vmatmul.mubr.f32.gmra.mrb[24].mxu1 %v520_v37 }
  0xe0   : > { %689 = vmatprep.mubr.f32.mxu0 %v491_v38  ;;  %769 = vmatprep.mubr.f32.mxu1 %v523_v39 }
  0xe3   : > { %690 = vmatmul.mubr.f32.gmra.mrb[26].mxu0 %v490_v40  ;;  %770 = vmatmul.mubr.f32.gmra.mrb[26].mxu1 %v522_v41 }
  0xe4   : > { %694 = vmatprep.mubr.f32.mxu0 %v493_v42  ;;  %774 = vmatprep.mubr.f32.mxu1 %v525_v43  ;;  %v439_v42 = vld [vmem:[#allocation2 + $0x38] sm:$0xff] }
  0xe5   : > { %v455_v43 = vld [vmem:[#allocation2 + $0xb8] sm:$0xff] }
  0xe7   : > { %695 = vmatmul.mubr.f32.gmra.mrb[28].mxu0 %v492_v44  ;;  %775 = vmatmul.mubr.f32.gmra.mrb[28].mxu1 %v524_v45 }
  0xe8   : > { %699 = vmatprep.mubr.f32.mxu0 %v495_v46  ;;  %779 = vmatprep.mubr.f32.mxu1 %v527_v47 }
  0xeb   : > { %700 = vmatmul.mubr.f32.gmra.mrb[30].mxu0 %v494_v48  ;;  %780 = vmatmul.mubr.f32.gmra.mrb[30].mxu1 %v526_v49 }
 0x182   : > { %v626_v52 = vpop.f32.mrb[0].mxu0  ;;  %v706_v53 = vpop.f32.mrb[0].mxu1 }
 0x183   : > { %v785_v54 = vadd.f32 %v626_v52, %v432_v50  ;;  %v801_v55 = vadd.f32 %v706_v53, %v448_v51  ;;  %v628_v56 = vpop.f32.mrb[1].mxu0  ;;  %v708_v57 = vpop.f32.mrb[1].mxu1  ;;  %v440_v50 = vld [vmem:[#allocation2 + $0x40] sm:$0xff] }
 0x184   : > { %v456_v51 = vld [vmem:[#allocation2 + $0xc0] sm:$0xff] }
 0x185   : > { %818 = vst.msk [vmem:[#allocation2] sm:$0xff] %vm817_vm1, %v785_v54  ;;  %834 = vst.msk [vmem:[#allocation2 + $0x80] sm:$0xff] %vm817_vm1, %v801_v55 }
 0x186   : > { %v631_v60 = vpop.f32.mrb[2].mxu0  ;;  %v711_v61 = vpop.f32.mrb[2].mxu1 }
 0x187   : > { %v786_v62 = vadd.f32 %v631_v60, %v433_v58  ;;  %v802_v63 = vadd.f32 %v711_v61, %v449_v59  ;;  %v633_v0 = vpop.f32.mrb[3].mxu0  ;;  %v713_v1 = vpop.f32.mrb[3].mxu1  ;;  %v441_v58 = vld [vmem:[#allocation2 + $0x48] sm:$0xff] }
 0x188   : > { %v457_v59 = vld [vmem:[#allocation2 + $0xc8] sm:$0xff] }
 0x189   : > { %819 = vst.msk [vmem:[#allocation2 + $0x8] sm:$0xff] %vm817_vm1, %v786_v62  ;;  %835 = vst.msk [vmem:[#allocation2 + $0x88] sm:$0xff] %vm817_vm1, %v802_v63 }
 0x18a   : > { %v636_v4 = vpop.f32.mrb[4].mxu0  ;;  %v716_v5 = vpop.f32.mrb[4].mxu1 }
 0x18b   : > { %v787_v6 = vadd.f32 %v636_v4, %v434_v2  ;;  %v803_v7 = vadd.f32 %v716_v5, %v450_v3  ;;  %v638_v8 = vpop.f32.mrb[5].mxu0  ;;  %v718_v9 = vpop.f32.mrb[5].mxu1  ;;  %v442_v2 = vld [vmem:[#allocation2 + $0x50] sm:$0xff] }
 0x18c   : > { %v458_v3 = vld [vmem:[#allocation2 + $0xd0] sm:$0xff] }
 0x18d   : > { %820 = vst.msk [vmem:[#allocation2 + $0x10] sm:$0xff] %vm817_vm1, %v787_v6  ;;  %836 = vst.msk [vmem:[#allocation2 + $0x90] sm:$0xff] %vm817_vm1, %v803_v7 }
 0x18e   : > { %v641_v12 = vpop.f32.mrb[6].mxu0  ;;  %v721_v13 = vpop.f32.mrb[6].mxu1 }
 0x18f   : > { %v788_v14 = vadd.f32 %v641_v12, %v435_v10  ;;  %v804_v15 = vadd.f32 %v721_v13, %v451_v11  ;;  %v643_v16 = vpop.f32.mrb[7].mxu0  ;;  %v723_v17 = vpop.f32.mrb[7].mxu1  ;;  %v443_v10 = vld [vmem:[#allocation2 + $0x58] sm:$0xff] }
 0x190   : > { %v459_v11 = vld [vmem:[#allocation2 + $0xd8] sm:$0xff] }
 0x191   : > { %821 = vst.msk [vmem:[#allocation2 + $0x18] sm:$0xff] %vm817_vm1, %v788_v14  ;;  %837 = vst.msk [vmem:[#allocation2 + $0x98] sm:$0xff] %vm817_vm1, %v804_v15 }
 0x192   : > { %v646_v20 = vpop.f32.mrb[8].mxu0  ;;  %v726_v21 = vpop.f32.mrb[8].mxu1 }
 0x193   : > { %v789_v22 = vadd.f32 %v646_v20, %v436_v18  ;;  %v805_v23 = vadd.f32 %v726_v21, %v452_v19  ;;  %v648_v24 = vpop.f32.mrb[9].mxu0  ;;  %v728_v25 = vpop.f32.mrb[9].mxu1  ;;  %v444_v18 = vld [vmem:[#allocation2 + $0x60] sm:$0xff] }
 0x194   : > { %v460_v19 = vld [vmem:[#allocation2 + $0xe0] sm:$0xff] }
 0x195   : > { %822 = vst.msk [vmem:[#allocation2 + $0x20] sm:$0xff] %vm817_vm1, %v789_v22  ;;  %838 = vst.msk [vmem:[#allocation2 + $0xa0] sm:$0xff] %vm817_vm1, %v805_v23 }
 0x196   : > { %v651_v28 = vpop.f32.mrb[10].mxu0  ;;  %v731_v29 = vpop.f32.mrb[10].mxu1 }
 0x197   : > { %v790_v30 = vadd.f32 %v651_v28, %v437_v26  ;;  %v806_v31 = vadd.f32 %v731_v29, %v453_v27  ;;  %v653_v32 = vpop.f32.mrb[11].mxu0  ;;  %v733_v33 = vpop.f32.mrb[11].mxu1  ;;  %v445_v26 = vld [vmem:[#allocation2 + $0x68] sm:$0xff] }
 0x198   : > { %v461_v27 = vld [vmem:[#allocation2 + $0xe8] sm:$0xff] }
 0x199   : > { %823 = vst.msk [vmem:[#allocation2 + $0x28] sm:$0xff] %vm817_vm1, %v790_v30  ;;  %839 = vst.msk [vmem:[#allocation2 + $0xa8] sm:$0xff] %vm817_vm1, %v806_v31 }
 0x19a   : > { %v656_v36 = vpop.f32.mrb[12].mxu0  ;;  %v736_v37 = vpop.f32.mrb[12].mxu1 }
 0x19b   : > { %v791_v38 = vadd.f32 %v656_v36, %v438_v34  ;;  %v807_v39 = vadd.f32 %v736_v37, %v454_v35  ;;  %v658_v40 = vpop.f32.mrb[13].mxu0  ;;  %v738_v41 = vpop.f32.mrb[13].mxu1  ;;  %v446_v34 = vld [vmem:[#allocation2 + $0x70] sm:$0xff] }
 0x19c   : > { %v462_v35 = vld [vmem:[#allocation2 + $0xf0] sm:$0xff] }
 0x19d   : > { %824 = vst.msk [vmem:[#allocation2 + $0x30] sm:$0xff] %vm817_vm1, %v791_v38  ;;  %840 = vst.msk [vmem:[#allocation2 + $0xb0] sm:$0xff] %vm817_vm1, %v807_v39 }
 0x19e   : > { %v661_v44 = vpop.f32.mrb[14].mxu0  ;;  %v741_v45 = vpop.f32.mrb[14].mxu1 }
 0x19f   : > { %v792_v46 = vadd.f32 %v661_v44, %v439_v42  ;;  %v808_v47 = vadd.f32 %v741_v45, %v455_v43  ;;  %v663_v48 = vpop.f32.mrb[15].mxu0  ;;  %v743_v49 = vpop.f32.mrb[15].mxu1  ;;  %v447_v42 = vld [vmem:[#allocation2 + $0x78] sm:$0xff] }
 0x1a0   : > { %v463_v43 = vld [vmem:[#allocation2 + $0xf8] sm:$0xff] }
 0x1a1   : > { %825 = vst.msk [vmem:[#allocation2 + $0x38] sm:$0xff] %vm817_vm1, %v792_v46  ;;  %841 = vst.msk [vmem:[#allocation2 + $0xb8] sm:$0xff] %vm817_vm1, %v808_v47 }
 0x1a2   : > { %v666_v52 = vpop.f32.mrb[16].mxu0  ;;  %v746_v53 = vpop.f32.mrb[16].mxu1 }
 0x1a3   : > { %v793_v54 = vadd.f32 %v666_v52, %v440_v50  ;;  %v809_v55 = vadd.f32 %v746_v53, %v456_v51  ;;  %v668_v56 = vpop.f32.mrb[17].mxu0  ;;  %v748_v57 = vpop.f32.mrb[17].mxu1  ;;  %v982_v50 = vld [vmem:[%s3410_s4] sm:$0xff] (!%p1973_p4)  ;;  %v983_v51 = vld [vmem:[%s3410_s4 + $0x8] sm:$0xff] (!%p1973_p4)  ;;  %v984_v52 = vld [vmem:[%s3410_s4 + $0x10] sm:$0xff] (!%p1973_p4) }
 0x1a4   : > { %v2282_v53 = vpack.c.bf16 (!%p1973_p4), %v983_v51, %v982_v50  ;;  %v886_v56 = vld [vmem:[%s2848_s21] sm:$0xff] (!%p1973_p4) }
 0x1a5   : > { %826 = vst.msk [vmem:[#allocation2 + $0x40] sm:$0xff] %vm817_vm1, %v793_v54  ;;  %842 = vst.msk [vmem:[#allocation2 + $0xc0] sm:$0xff] %vm817_vm1, %v809_v55  ;;  %v985_v54 = vld [vmem:[%s3410_s4 + $0x18] sm:$0xff] (!%p1973_p4)  ;;  %v854_v55 = vld [vmem:[#allocation2] sm:$0xff] (!%p1973_p4) }
 0x1a6   : > { %v671_v60 = vpop.f32.mrb[18].mxu0  ;;  %v751_v61 = vpop.f32.mrb[18].mxu1  ;;  %v2286_v57 = vpack.c.bf16 (!%p1973_p4), %v985_v54, %v984_v52  ;;  %2283 = vmatprep.subr.bf16.mxu0 (!%p1973_p4), %v2282_v53  ;;  %2291 = vmatprep.subr.bf16.mxu1 (!%p1973_p4), %v2282_v53  ;;  %v996_v54 = vld [vmem:[%s2843_s18 + $0x50] sm:$0xff] (!%p1973_p4) }
 0x1a7   : > { %v794_v62 = vadd.f32 %v671_v60, %v441_v58  ;;  %v810_v63 = vadd.f32 %v751_v61, %v457_v59  ;;  %v673_v0 = vpop.f32.mrb[19].mxu0  ;;  %v753_v1 = vpop.f32.mrb[19].mxu1  ;;  %v918_v58 = vadd.f32 (!%p1973_p4), %v886_v56, %v854_v55  ;;  %v855_v59 = vld [vmem:[#allocation2 + $0x8] sm:$0xff] (!%p1973_p4)  ;;  %v986_v61 = vld [vmem:[%s2843_s18] sm:$0xff] (!%p1973_p4)  ;;  %2285 = vmatpush3.bf16.msra.mxu0 (!%p1973_p4), %v2282_v53  ;;  %2293 = vmatpush3.bf16.msra.mxu1 (!%p1973_p4), %v2282_v53  ;;  %v900_v56 = vld [vmem:[%s2848_s21 + $0x70] sm:$0xff] (!%p1973_p4) }
 0x1a8   : > { %v887_v60 = vld [vmem:[%s2848_s21 + $0x8] sm:$0xff] (!%p1973_p4)  ;;  %v888_v0 = vld [vmem:[%s2848_s21 + $0x10] sm:$0xff] (!%p1973_p4)  ;;  %2287 = vmatprep.subr.bf16.mxu0 (!%p1973_p4), %v2286_v57  ;;  %2295 = vmatprep.subr.bf16.mxu1 (!%p1973_p4), %v2286_v57 }
 0x1a9   : > { %827 = vst.msk [vmem:[#allocation2 + $0x48] sm:$0xff] %vm817_vm1, %v794_v62  ;;  %843 = vst.msk [vmem:[#allocation2 + $0xc8] sm:$0xff] %vm817_vm1, %v810_v63  ;;  %v919_v62 = vadd.f32 (!%p1973_p4), %v887_v60, %v855_v59  ;;  %v856_v63 = vld [vmem:[#allocation2 + $0x10] sm:$0xff] (!%p1973_p4)  ;;  %v950_v1 = vmul.f32 (!%p1973_p4), 0.5, %v918_v58  ;;  %2186 = vmatprep.mubr.msk.f32.mxu1 (!%p1973_p4), %vm817_vm1, %v986_v61  ;;  %v899_v53 = vld [vmem:[%s2848_s21 + $0x68] sm:$0xff] (!%p1973_p4) }
 0x1aa   : > { %v676_v4 = vpop.f32.mrb[20].mxu0  ;;  %v756_v5 = vpop.f32.mrb[20].mxu1  ;;  %v997_v59 = vld [vmem:[%s2843_s18 + $0x58] sm:$0xff] (!%p1973_p4) }
 0x1ab   : > { %v795_v6 = vadd.f32 %v676_v4, %v442_v2  ;;  %v811_v7 = vadd.f32 %v756_v5, %v458_v3  ;;  %v678_v8 = vpop.f32.mrb[21].mxu0  ;;  %v758_v9 = vpop.f32.mrb[21].mxu1  ;;  %v920_v2 = vadd.f32 (!%p1973_p4), %v888_v0, %v856_v63  ;;  %v857_v3 = vld [vmem:[#allocation2 + $0x18] sm:$0xff] (!%p1973_p4)  ;;  %v858_v5 = vld [vmem:[#allocation2 + $0x20] sm:$0xff] (!%p1973_p4)  ;;  %2130 = vmatprep.mubr.msk.f32.mxu0 (!%p1973_p4), %vm817_vm1, %v950_v1  ;;  %2289 = vmatpush3.bf16.msra.mxu0 (!%p1973_p4), %v2286_v57 }
 0x1ac   : > { %v889_v4 = vld [vmem:[%s2848_s21 + $0x18] sm:$0xff] (!%p1973_p4)  ;;  %2297 = vmatpush3.bf16.msra.mxu1 (!%p1973_p4), %v2286_v57  ;;  %v987_v9 = vld [vmem:[%s2843_s18 + $0x8] sm:$0xff] (!%p1973_p4)  ;;  %v998_v0 = vld [vmem:[%s2843_s18 + $0x60] sm:$0xff] (!%p1973_p4) }
 0x1ad   : > { %828 = vst.msk [vmem:[#allocation2 + $0x50] sm:$0xff] %vm817_vm1, %v795_v6  ;;  %844 = vst.msk [vmem:[#allocation2 + $0xd0] sm:$0xff] %vm817_vm1, %v811_v7  ;;  %v890_v6 = vld [vmem:[%s2848_s21 + $0x20] sm:$0xff] (!%p1973_p4)  ;;  %v951_v7 = vmul.f32 (!%p1973_p4), 0.5, %v919_v62  ;;  %v921_v8 = vadd.f32 (!%p1973_p4), %v889_v4, %v857_v3  ;;  %v901_v63 = vld [vmem:[%s2848_s21 + $0x78] sm:$0xff] (!%p1973_p4) }
 0x1ae   : > { %v681_v12 = vpop.f32.mrb[22].mxu0  ;;  %v761_v13 = vpop.f32.mrb[22].mxu1  ;;  %v870_v1 = vld [vmem:[#allocation2 + $0x80] sm:$0xff] (!%p1973_p4) }
 0x1af   : > { %v796_v14 = vadd.f32 %v681_v12, %v443_v10  ;;  %v812_v15 = vadd.f32 %v761_v13, %v459_v11  ;;  %v683_v16 = vpop.f32.mrb[23].mxu0  ;;  %v763_v17 = vpop.f32.mrb[23].mxu1  ;;  %v952_v10 = vmul.f32 (!%p1973_p4), 0.5, %v920_v2  ;;  %v922_v11 = vadd.f32 (!%p1973_p4), %v890_v6, %v858_v5  ;;  %v859_v12 = vld [vmem:[#allocation2 + $0x28] sm:$0xff] (!%p1973_p4)  ;;  %2131 = vmatmul.mubr.msk.f32.vlgmr.msra.gmra.mrb[0].mxu0 (!%p1973_p4), %vm817_vm1, %v951_v7  ;;  %2187 = vmatmul.mubr.msk.f32.vlgmr.msra.gmra.mrb[0].mxu1 (!%p1973_p4), %vm817_vm1, %v987_v9  ;;  %v902_v2 = vld [vmem:[%s2848_s21 + $0x80] sm:$0xff] (!%p1973_p4) }
 0x1b0   : > { %v891_v13 = vld [vmem:[%s2848_s21 + $0x28] sm:$0xff] (!%p1973_p4)  ;;  %v892_v16 = vld [vmem:[%s2848_s21 + $0x30] sm:$0xff] (!%p1973_p4)  ;;  %v953_v17 = vmul.f32 (!%p1973_p4), 0.5, %v921_v8  ;;  %v934_v7 = vadd.f32 (!%p1973_p4), %v902_v2, %v870_v1 }
 0x1b1   : > { %829 = vst.msk [vmem:[#allocation2 + $0x58] sm:$0xff] %vm817_vm1, %v796_v14  ;;  %845 = vst.msk [vmem:[#allocation2 + $0xd8] sm:$0xff] %vm817_vm1, %v812_v15  ;;  %v988_v14 = vld [vmem:[%s2843_s18 + $0x10] sm:$0xff] (!%p1973_p4)  ;;  %2133 = vmatprep.mubr.msk.f32.mxu0 (!%p1973_p4), %vm817_vm1, %v952_v10  ;;  %v999_v5 = vld [vmem:[%s2843_s18 + $0x68] sm:$0xff] (!%p1973_p4) }
 0x1b2   : > { %v686_v20 = vpop.f32.mrb[24].mxu0  ;;  %v766_v21 = vpop.f32.mrb[24].mxu1  ;;  %v860_v15 = vld [vmem:[#allocation2 + $0x30] sm:$0xff] (!%p1973_p4)  ;;  %2189 = vmatprep.mubr.msk.f32.mxu1 (!%p1973_p4), %vm817_vm1, %v988_v14  ;;  %v871_v8 = vld [vmem:[#allocation2 + $0x88] sm:$0xff] (!%p1973_p4) }
 0x1b3   : > { %v797_v22 = vadd.f32 %v686_v20, %v444_v18  ;;  %v813_v23 = vadd.f32 %v766_v21, %v460_v19  ;;  %v688_v24 = vpop.f32.mrb[25].mxu0  ;;  %v768_v25 = vpop.f32.mrb[25].mxu1  ;;  %v923_v18 = vadd.f32 (!%p1973_p4), %v891_v13, %v859_v12  ;;  %v989_v19 = vld [vmem:[%s2843_s18 + $0x18] sm:$0xff] (!%p1973_p4)  ;;  %v954_v20 = vmul.f32 (!%p1973_p4), 0.5, %v922_v11  ;;  %2134 = vmatmul.mubr.msk.f32.gmra.mrb[2].mxu0 (!%p1973_p4), %vm817_vm1, %v953_v17  ;;  %v903_v9 = vld [vmem:[%s2848_s21 + $0x88] sm:$0xff] (!%p1973_p4)  ;;  %v1000_v10 = vld [vmem:[%s2843_s18 + $0x70] sm:$0xff] (!%p1973_p4) }
 0x1b4   : > { %v924_v21 = vadd.f32 (!%p1973_p4), %v892_v16, %v860_v15  ;;  %v990_v24 = vld [vmem:[%s2843_s18 + $0x20] sm:$0xff] (!%p1973_p4)  ;;  %2190 = vmatmul.mubr.msk.f32.gmra.mrb[2].mxu1 (!%p1973_p4), %vm817_vm1, %v989_v19  ;;  %v872_v11 = vld [vmem:[#allocation2 + $0x90] sm:$0xff] (!%p1973_p4)  ;;  %v935_v14 = vadd.f32 (!%p1973_p4), %v903_v9, %v871_v8  ;;  %v1001_v15 = vld [vmem:[%s2843_s18 + $0x78] sm:$0xff] (!%p1973_p4)  ;;  %v966_v16 = vmul.f32 (!%p1973_p4), 0.5, %v934_v7 }
 0x1b5   : > { %830 = vst.msk [vmem:[#allocation2 + $0x60] sm:$0xff] %vm817_vm1, %v797_v22  ;;  %846 = vst.msk [vmem:[#allocation2 + $0xe0] sm:$0xff] %vm817_vm1, %v813_v23  ;;  %v861_v22 = vld [vmem:[#allocation2 + $0x38] sm:$0xff] (!%p1973_p4)  ;;  %v862_v25 = vld [vmem:[#allocation2 + $0x40] sm:$0xff] (!%p1973_p4)  ;;  %2136 = vmatprep.mubr.msk.f32.mxu0 (!%p1973_p4), %vm817_vm1, %v954_v20  ;;  %2192 = vmatprep.mubr.msk.f32.mxu1 (!%p1973_p4), %vm817_vm1, %v990_v24 }
 0x1b6   : > { %v691_v28 = vpop.f32.mrb[26].mxu0  ;;  %v771_v29 = vpop.f32.mrb[26].mxu1  ;;  %v893_v23 = vld [vmem:[%s2848_s21 + $0x38] sm:$0xff] (!%p1973_p4)  ;;  %v904_v12 = vld [vmem:[%s2848_s21 + $0x90] sm:$0xff] (!%p1973_p4)  ;;  %v1002_v20 = vld [vmem:[%s2843_s18 + $0x80] sm:$0xff] (!%p1973_p4) }
 0x1b7   : > { %v798_v30 = vadd.f32 %v691_v28, %v445_v26  ;;  %v814_v31 = vadd.f32 %v771_v29, %v461_v27  ;;  %v693_v32 = vpop.f32.mrb[27].mxu0  ;;  %v773_v33 = vpop.f32.mrb[27].mxu1  ;;  %v894_v26 = vld [vmem:[%s2848_s21 + $0x40] sm:$0xff] (!%p1973_p4)  ;;  %v955_v27 = vmul.f32 (!%p1973_p4), 0.5, %v923_v18  ;;  %v925_v28 = vadd.f32 (!%p1973_p4), %v893_v23, %v861_v22  ;;  %v991_v29 = vld [vmem:[%s2843_s18 + $0x28] sm:$0xff] (!%p1973_p4)  ;;  %v873_v18 = vld [vmem:[#allocation2 + $0x98] sm:$0xff] (!%p1973_p4) }
 0x1b8   : > { %v863_v32 = vld [vmem:[#allocation2 + $0x48] sm:$0xff] (!%p1973_p4)  ;;  %2193 = vmatmul.mubr.msk.f32.gmra.mrb[4].mxu1 (!%p1973_p4), %vm817_vm1, %v991_v29  ;;  %v936_v17 = vadd.f32 (!%p1973_p4), %v904_v12, %v872_v11  ;;  %v905_v19 = vld [vmem:[%s2848_s21 + $0x98] sm:$0xff] (!%p1973_p4)  ;;  %v906_v22 = vld [vmem:[%s2848_s21 + $0xa0] sm:$0xff] (!%p1973_p4)  ;;  %v967_v23 = vmul.f32 (!%p1973_p4), 0.5, %v935_v14 }
 0x1b9   : > { %831 = vst.msk [vmem:[#allocation2 + $0x68] sm:$0xff] %vm817_vm1, %v798_v30  ;;  %847 = vst.msk [vmem:[#allocation2 + $0xe8] sm:$0xff] %vm817_vm1, %v814_v31  ;;  %v956_v30 = vmul.f32 (!%p1973_p4), 0.5, %v924_v21  ;;  %v926_v31 = vadd.f32 (!%p1973_p4), %v894_v26, %v862_v25  ;;  %v895_v33 = vld [vmem:[%s2848_s21 + $0x48] sm:$0xff] (!%p1973_p4)  ;;  %2137 = vmatmul.mubr.msk.f32.gmra.mrb[4].mxu0 (!%p1973_p4), %vm817_vm1, %v955_v27  ;;  %v874_v21 = vld [vmem:[#allocation2 + $0xa0] sm:$0xff] (!%p1973_p4)  ;;  %v937_v24 = vadd.f32 (!%p1973_p4), %v905_v19, %v873_v18 }
 0x1ba   : > { %v696_v36 = vpop.f32.mrb[28].mxu0  ;;  %v776_v37 = vpop.f32.mrb[28].mxu1  ;;  %v1003_v25 = vld [vmem:[%s2843_s18 + $0x88] sm:$0xff] (!%p1973_p4)  ;;  %v968_v26 = vmul.f32 (!%p1973_p4), 0.5, %v936_v17  ;;  %v938_v27 = vadd.f32 (!%p1973_p4), %v906_v22, %v874_v21  ;;  %v916_v8 = vld [vmem:[%s2848_s21 + $0xf0] sm:$0xff] (!%p1973_p4)  ;;  %v1013_v11 = vld [vmem:[%s2843_s18 + $0xd8] sm:$0xff] (!%p1973_p4) }
 0x1bb   : > { %v799_v38 = vadd.f32 %v696_v36, %v446_v34  ;;  %v815_v39 = vadd.f32 %v776_v37, %v462_v35  ;;  %v698_v40 = vpop.f32.mrb[29].mxu0  ;;  %v778_v41 = vpop.f32.mrb[29].mxu1  ;;  %853 = sbr.rel (%p1973_p4) target bundleno = 713 (0x2c9), region = 56  ;;  %v992_v34 = vld [vmem:[%s2843_s18 + $0x30] sm:$0xff] (!%p1973_p4)  ;;  %v957_v37 = vmul.f32 (!%p1973_p4), 0.5, %v925_v28  ;;  %2139 = vmatprep.mubr.msk.f32.mxu0 (!%p1973_p4), %vm817_vm1, %v956_v30  ;;  %v875_v28 = vld [vmem:[#allocation2 + $0xa8] sm:$0xff] (!%p1973_p4) }
 0x1bc   : > { %v864_v35 = vld [vmem:[#allocation2 + $0x50] sm:$0xff] (!%p1973_p4)  ;;  %2195 = vmatprep.mubr.msk.f32.mxu1 (!%p1973_p4), %vm817_vm1, %v992_v34  ;;  %v958_v40 = vmul.f32 (!%p1973_p4), 0.5, %v926_v31  ;;  %v907_v29 = vld [vmem:[%s2848_s21 + $0xa8] sm:$0xff] (!%p1973_p4) }
 0x1bd   : > { %832 = vst.msk [vmem:[#allocation2 + $0x70] sm:$0xff] %vm817_vm1, %v799_v38  ;;  %848 = vst.msk [vmem:[#allocation2 + $0xf0] sm:$0xff] %vm817_vm1, %v815_v39  ;;  %v896_v36 = vld [vmem:[%s2848_s21 + $0x50] sm:$0xff] (!%p1973_p4)  ;;  %v927_v38 = vadd.f32 (!%p1973_p4), %v895_v33, %v863_v32  ;;  %v993_v39 = vld [vmem:[%s2843_s18 + $0x38] sm:$0xff] (!%p1973_p4)  ;;  %2140 = vmatmul.mubr.msk.f32.gmra.mrb[6].mxu0 (!%p1973_p4), %vm817_vm1, %v957_v37  ;;  %v969_v33 = vmul.f32 (!%p1973_p4), 0.5, %v937_v24  ;;  %v939_v34 = vadd.f32 (!%p1973_p4), %v907_v29, %v875_v28 }
 0x1be   : > { %v701_v44 = vpop.f32.mrb[30].mxu0  ;;  %v781_v45 = vpop.f32.mrb[30].mxu1  ;;  %v928_v41 = vadd.f32 (!%p1973_p4), %v896_v36, %v864_v35  ;;  %2196 = vmatmul.mubr.msk.f32.gmra.mrb[6].mxu1 (!%p1973_p4), %vm817_vm1, %v993_v39  ;;  %2142 = vmatprep.mubr.msk.f32.mxu0 (!%p1973_p4), %vm817_vm1, %v958_v40  ;;  %v1004_v30 = vld [vmem:[%s2843_s18 + $0x90] sm:$0xff] (!%p1973_p4)  ;;  %v1005_v35 = vld [vmem:[%s2843_s18 + $0x98] sm:$0xff] (!%p1973_p4)  ;;  %v970_v36 = vmul.f32 (!%p1973_p4), 0.5, %v938_v27  ;;  %v1006_v40 = vld [vmem:[%s2843_s18 + $0xa0] sm:$0xff] (!%p1973_p4) }
 0x1bf   : > { %v800_v46 = vadd.f32 %v701_v44, %v447_v42  ;;  %v816_v47 = vadd.f32 %v781_v45, %v463_v43  ;;  %v703_v48 = vpop.f32.mrb[31].mxu0  ;;  %v783_v49 = vpop.f32.mrb[31].mxu1  ;;  %v865_v42 = vld [vmem:[#allocation2 + $0x58] sm:$0xff] (!%p1973_p4)  ;;  %v994_v44 = vld [vmem:[%s2843_s18 + $0x40] sm:$0xff] (!%p1973_p4)  ;;  %v876_v31 = vld [vmem:[#allocation2 + $0xb0] sm:$0xff] (!%p1973_p4) }
 0x1c0   : > { %v897_v43 = vld [vmem:[%s2848_s21 + $0x58] sm:$0xff] (!%p1973_p4)  ;;  %v866_v45 = vld [vmem:[#allocation2 + $0x60] sm:$0xff] (!%p1973_p4)  ;;  %2198 = vmatprep.mubr.msk.f32.mxu1 (!%p1973_p4), %vm817_vm1, %v994_v44  ;;  %v995_v49 = vld [vmem:[%s2843_s18 + $0x48] sm:$0xff] (!%p1973_p4)  ;;  %v960_v50 = vmul.f32 (!%p1973_p4), 0.5, %v928_v41 }
 0x1c1   : > { %833 = vst.msk [vmem:[#allocation2 + $0x78] sm:$0xff] %vm817_vm1, %v800_v46  ;;  %849 = vst.msk [vmem:[#allocation2 + $0xf8] sm:$0xff] %vm817_vm1, %v816_v47  ;;  %v898_v46 = vld [vmem:[%s2848_s21 + $0x60] sm:$0xff] (!%p1973_p4)  ;;  %v959_v47 = vmul.f32 (!%p1973_p4), 0.5, %v927_v38  ;;  %v929_v48 = vadd.f32 (!%p1973_p4), %v897_v43, %v865_v42  ;;  %v867_v52 = vld [vmem:[#allocation2 + $0x68] sm:$0xff] (!%p1973_p4)  ;;  %v971_v43 = vmul.f32 (!%p1973_p4), 0.5, %v939_v34 }
 0x1c2   : > { %v930_v51 = vadd.f32 %v898_v46, %v866_v45  ;;  %2199 = vmatmul.mubr.msk.f32.gmra.mrb[8].mxu1 %vm817_vm1, %v995_v49  ;;  %v931_v58 = vadd.f32 %v899_v53, %v867_v52  ;;  %v908_v32 = vld [vmem:[%s2848_s21 + $0xb0] sm:$0xff]  ;;  %v877_v38 = vld [vmem:[#allocation2 + $0xb8] sm:$0xff]  ;;  %v878_v41 = vld [vmem:[#allocation2 + $0xc0] sm:$0xff] }
 0x1c3   : > { %2143 = vmatmul.mubr.msk.f32.gmra.mrb[8].mxu0 %vm817_vm1, %v959_v47  ;;  %v961_v57 = vmul.f32 0.5, %v929_v48  ;;  %2201 = vmatprep.mubr.msk.f32.mxu1 %vm817_vm1, %v996_v54  ;;  %v940_v37 = vadd.f32 %v908_v32, %v876_v31  ;;  %v909_v39 = vld [vmem:[%s2848_s21 + $0xb8] sm:$0xff]  ;;  %v910_v42 = vld [vmem:[%s2848_s21 + $0xc0] sm:$0xff]  ;;  %v1007_v45 = vld [vmem:[%s2843_s18 + $0xa8] sm:$0xff] }
 0x1c4   : > { %v868_v55 = vld [vmem:[#allocation2 + $0x70] sm:$0xff]  ;;  %2145 = vmatprep.mubr.msk.f32.mxu0 %vm817_vm1, %v960_v50  ;;  %v962_v60 = vmul.f32 0.5, %v930_v51  ;;  %v963_v3 = vmul.f32 0.5, %v931_v58  ;;  %v941_v44 = vadd.f32 %v909_v39, %v877_v38  ;;  %v942_v47 = vadd.f32 %v910_v42, %v878_v41  ;;  %v879_v48 = vld [vmem:[#allocation2 + $0xc8] sm:$0xff]  ;;  %v881_v58 = vld [vmem:[#allocation2 + $0xd8] sm:$0xff] }
 0x1c5   : > { %v932_v61 = vadd.f32 %v900_v56, %v868_v55  ;;  %v972_v46 = vmul.f32 0.5, %v940_v37  ;;  %v911_v49 = vld [vmem:[%s2848_s21 + $0xc8] sm:$0xff]  ;;  %v1008_v50 = vld [vmem:[%s2843_s18 + $0xb0] sm:$0xff]  ;;  %v1009_v55 = vld [vmem:[%s2843_s18 + $0xb8] sm:$0xff] }
 0x1c6   : > { %2202 = vmatmul.mubr.msk.f32.gmra.mrb[10].mxu1 %vm817_vm1, %v997_v59  ;;  %v880_v51 = vld [vmem:[#allocation2 + $0xd0] sm:$0xff]  ;;  %v973_v53 = vmul.f32 0.5, %v941_v44  ;;  %v943_v54 = vadd.f32 %v911_v49, %v879_v48  ;;  %v974_v56 = vmul.f32 0.5, %v942_v47  ;;  %v913_v59 = vld [vmem:[%s2848_s21 + $0xd8] sm:$0xff]  ;;  %v1011_v1 = vld [vmem:[%s2843_s18 + $0xc8] sm:$0xff] }
 0x1c7   : > { %2146 = vmatmul.mubr.msk.f32.gmra.mrb[10].mxu0 %vm817_vm1, %v961_v57  ;;  %2204 = vmatprep.mubr.msk.f32.mxu1 %vm817_vm1, %v998_v0  ;;  %v964_v6 = vmul.f32 0.5, %v932_v61  ;;  %v912_v52 = vld [vmem:[%s2848_s21 + $0xd0] sm:$0xff]  ;;  %v882_v61 = vld [vmem:[#allocation2 + $0xe0] sm:$0xff]  ;;  %v945_v0 = vadd.f32 %v913_v59, %v881_v58  ;;  %v1015_v19 = vld [vmem:[%s2843_s18 + $0xe8] sm:$0xff] }
 0x1c8   : > { %v869_v62 = vld [vmem:[#allocation2 + $0x78] sm:$0xff]  ;;  %2148 = vmatprep.mubr.msk.f32.mxu0 %vm817_vm1, %v962_v60  ;;  %v944_v57 = vadd.f32 %v912_v52, %v880_v51  ;;  %v1010_v60 = vld [vmem:[%s2843_s18 + $0xc0] sm:$0xff]  ;;  %v884_v7 = vld [vmem:[#allocation2 + $0xf0] sm:$0xff] }
 0x1c9   : > { %v933_v4 = vadd.f32 %v901_v63, %v869_v62  ;;  %v914_v62 = vld [vmem:[%s2848_s21 + $0xe0] sm:$0xff]  ;;  %v975_v63 = vmul.f32 0.5, %v943_v54  ;;  %v977_v9 = vmul.f32 0.5, %v945_v0  ;;  %v885_v14 = vld [vmem:[#allocation2 + $0xf8] sm:$0xff]  ;;  %v1016_v21 = vld [vmem:[%s2843_s18 + $0xf0] sm:$0xff] }
 0x1ca   : > { %2205 = vmatmul.mubr.msk.f32.gmra.mrb[12].mxu1 %vm817_vm1, %v999_v5  ;;  %v976_v2 = vmul.f32 0.5, %v944_v57  ;;  %v915_v5 = vld [vmem:[%s2848_s21 + $0xe8] sm:$0xff] }
 0x1cb   : > { %2149 = vmatmul.mubr.msk.f32.gmra.mrb[12].mxu0 %vm817_vm1, %v963_v3  ;;  %v965_v13 = vmul.f32 0.5, %v933_v4  ;;  %2207 = vmatprep.mubr.msk.f32.mxu1 %vm817_vm1, %v1000_v10  ;;  %v946_v3 = vadd.f32 %v914_v62, %v882_v61  ;;  %v883_v4 = vld [vmem:[#allocation2 + $0xe8] sm:$0xff] }
 0x1cc   : > { %2151 = vmatprep.mubr.msk.f32.mxu0 %vm817_vm1, %v964_v6  ;;  %v1012_v6 = vld [vmem:[%s2843_s18 + $0xd0] sm:$0xff]  ;;  %v947_v10 = vadd.f32 %v915_v5, %v883_v4 }
 0x1cd   : > { %v978_v12 = vmul.f32 0.5, %v946_v3 }
 0x1ce   : > { %2208 = vmatmul.mubr.msk.f32.gmra.mrb[14].mxu1 %vm817_vm1, %v1001_v15  ;;  %v917_v15 = vld [vmem:[%s2848_s21 + $0xf8] sm:$0xff]  ;;  %v979_v17 = vmul.f32 0.5, %v947_v10 }
 0x1cf   : > { %2152 = vmatmul.mubr.msk.f32.gmra.mrb[14].mxu0 %vm817_vm1, %v965_v13  ;;  %2210 = vmatprep.mubr.msk.f32.mxu1 %vm817_vm1, %v1002_v20  ;;  %v948_v13 = vadd.f32 %v916_v8, %v884_v7  ;;  %v949_v18 = vadd.f32 %v917_v15, %v885_v14 }
 0x1d0   : > { %2154 = vmatprep.mubr.msk.f32.mxu0 %vm817_vm1, %v966_v16  ;;  %v1014_v16 = vld [vmem:[%s2843_s18 + $0xe0] sm:$0xff] }
 0x1d1   : > { %v980_v20 = vmul.f32 0.5, %v948_v13  ;;  %v981_v22 = vmul.f32 0.5, %v949_v18 }
 0x1d2   : > { %2211 = vmatmul.mubr.msk.f32.gmra.mrb[16].mxu1 %vm817_vm1, %v1003_v25 }
 0x1d3   : > { %2155 = vmatmul.mubr.msk.f32.gmra.mrb[16].mxu0 %vm817_vm1, %v967_v23  ;;  %2213 = vmatprep.mubr.msk.f32.mxu1 %vm817_vm1, %v1004_v30  ;;  %v1017_v23 = vld [vmem:[%s2843_s18 + $0xf8] sm:$0xff] }
 0x1d4   : > { %2157 = vmatprep.mubr.msk.f32.mxu0 %vm817_vm1, %v968_v26  ;;  %v3196_v26 = vld [vmem:[%s3411_s5] ss:$0 sm:$0xff] }
 0x1d6   : > { %2214 = vmatmul.mubr.msk.f32.gmra.mrb[18].mxu1 %vm817_vm1, %v1005_v35 }
 0x1d7   : > { %2158 = vmatmul.mubr.msk.f32.gmra.mrb[18].mxu0 %vm817_vm1, %v969_v33  ;;  %2216 = vmatprep.mubr.msk.f32.mxu1 %vm817_vm1, %v1006_v40 }
 0x1d8   : > { %2160 = vmatprep.mubr.msk.f32.mxu0 %vm817_vm1, %v970_v36 }
 0x1da   : > { %2217 = vmatmul.mubr.msk.f32.gmra.mrb[20].mxu1 %vm817_vm1, %v1007_v45 }
 0x1db   : > { %2161 = vmatmul.mubr.msk.f32.gmra.mrb[20].mxu0 %vm817_vm1, %v971_v43  ;;  %2219 = vmatprep.mubr.msk.f32.mxu1 %vm817_vm1, %v1008_v50 }
 0x1dc   : > { %2163 = vmatprep.mubr.msk.f32.mxu0 %vm817_vm1, %v972_v46 }
 0x1de   : > { %2220 = vmatmul.mubr.msk.f32.gmra.mrb[22].mxu1 %vm817_vm1, %v1009_v55 }
 0x1df   : > { %2164 = vmatmul.mubr.msk.f32.gmra.mrb[22].mxu0 %vm817_vm1, %v973_v53  ;;  %2222 = vmatprep.mubr.msk.f32.mxu1 %vm817_vm1, %v1010_v60 }
 0x1e0   : > { %2166 = vmatprep.mubr.msk.f32.mxu0 %vm817_vm1, %v974_v56 }
 0x1e2   : > { %2223 = vmatmul.mubr.msk.f32.gmra.mrb[24].mxu1 %vm817_vm1, %v1011_v1 }
 0x1e3   : > { %2167 = vmatmul.mubr.msk.f32.gmra.mrb[24].mxu0 %vm817_vm1, %v975_v63  ;;  %2225 = vmatprep.mubr.msk.f32.mxu1 %vm817_vm1, %v1012_v6 }
 0x1e4   : > { %2169 = vmatprep.mubr.msk.f32.mxu0 %vm817_vm1, %v976_v2 }
 0x1e6   : > { %2226 = vmatmul.mubr.msk.f32.gmra.mrb[26].mxu1 %vm817_vm1, %v1013_v11 }
 0x1e7   : > { %2170 = vmatmul.mubr.msk.f32.gmra.mrb[26].mxu0 %vm817_vm1, %v977_v9  ;;  %2228 = vmatprep.mubr.msk.f32.mxu1 %vm817_vm1, %v1014_v16 }
 0x1e8   : > { %2172 = vmatprep.mubr.msk.f32.mxu0 %vm817_vm1, %v978_v12 }
 0x1ea   : > { %2229 = vmatmul.mubr.msk.f32.gmra.mrb[28].mxu1 %vm817_vm1, %v1015_v19 }
 0x1eb   : > { %2173 = vmatmul.mubr.msk.f32.gmra.mrb[28].mxu0 %vm817_vm1, %v979_v17  ;;  %2231 = vmatprep.mubr.msk.f32.mxu1 %vm817_vm1, %v1016_v21 }
 0x1ec   : > { %2175 = vmatprep.mubr.msk.f32.mxu0 %vm817_vm1, %v980_v20 }
 0x1ee   : > { %2232 = vmatmul.mubr.msk.f32.gmra.mrb[30].mxu1 %vm817_vm1, %v1017_v23 }
 0x1ef   : > { %2176 = vmatmul.mubr.msk.f32.gmra.mrb[30].mxu0 %vm817_vm1, %v981_v22 }
 0x282   : > { %v2132_v24 = vpop.f32.mrb[0].mxu0  ;;  %v2188_v25 = vpop.f32.mrb[0].mxu1 }
 0x283   : > { %1340 = vst [vmem:[%s2857_s29 + $0x8] sm:$0xff] %v2132_v24  ;;  %v1539_v27 = vadd.f32 %v2188_v25, %v2132_v24  ;;  %v1180_v28 = vpop.f32.mrb[1].mxu0  ;;  %v1533_v29 = vpop.f32.mrb[1].mxu1 }
 0x284   : > { %1339 = vst [vmem:[%s2857_s29] sm:$0xff] %v1180_v28  ;;  %v1534_v30 = vadd.f32 %v1533_v29, %v1180_v28 }
 0x285   : > { %v1700_v31 = vadd.f32 %v3196_v26, %v1539_v27 }
 0x286   : > { %v1699_v32 = vadd.f32 %v3196_v26, %v1534_v30  ;;  %v2135_v33 = vpop.f32.mrb[2].mxu0 }
 0x287   : > { %v2191_v34 = vpop.f32.mrb[2].mxu1  ;;  %1732 = vst [vmem:[%s2855_s9 + $0x8] sm:$0xff] %v1700_v31  ;;  %1342 = vst [vmem:[%s2857_s29 + $0x18] sm:$0xff] %v2135_v33  ;;  %v1190_v36 = vpop.f32.mrb[3].mxu0 }
 0x288   : > { %v1549_v35 = vadd.f32 %v2191_v34, %v2135_v33  ;;  %v1543_v37 = vpop.f32.mrb[3].mxu1  ;;  %1731 = vst [vmem:[%s2855_s9] sm:$0xff] %v1699_v32  ;;  %1341 = vst [vmem:[%s2857_s29 + $0x10] sm:$0xff] %v1190_v36 }
 0x289   : > { %v1544_v38 = vadd.f32 %v1543_v37, %v1190_v36 }
 0x28a   : > { %v1702_v39 = vadd.f32 %v3196_v26, %v1549_v35 }
 0x28b   : > { %v1701_v40 = vadd.f32 %v3196_v26, %v1544_v38  ;;  %v2194_v42 = vpop.f32.mrb[4].mxu1 }
 0x28c   : > { %v2138_v41 = vpop.f32.mrb[4].mxu0  ;;  %1734 = vst [vmem:[%s2855_s9 + $0x18] sm:$0xff] %v1702_v39  ;;  %v1553_v45 = vpop.f32.mrb[5].mxu1 }
 0x28d   : > { %1344 = vst [vmem:[%s2857_s29 + $0x28] sm:$0xff] %v2138_v41  ;;  %v1559_v43 = vadd.f32 %v2194_v42, %v2138_v41  ;;  %v1200_v44 = vpop.f32.mrb[5].mxu0  ;;  %1733 = vst [vmem:[%s2855_s9 + $0x10] sm:$0xff] %v1701_v40 }
 0x28e   : > { %1343 = vst [vmem:[%s2857_s29 + $0x20] sm:$0xff] %v1200_v44  ;;  %v1554_v46 = vadd.f32 %v1553_v45, %v1200_v44 }
 0x28f   : > { %v1704_v47 = vadd.f32 %v3196_v26, %v1559_v43 }
 0x290   : > { %v1703_v48 = vadd.f32 %v3196_v26, %v1554_v46  ;;  %v2141_v49 = vpop.f32.mrb[6].mxu0 }
 0x291   : > { %v2197_v50 = vpop.f32.mrb[6].mxu1  ;;  %1736 = vst [vmem:[%s2855_s9 + $0x28] sm:$0xff] %v1704_v47  ;;  %1346 = vst [vmem:[%s2857_s29 + $0x38] sm:$0xff] %v2141_v49  ;;  %v1210_v52 = vpop.f32.mrb[7].mxu0 }
 0x292   : > { %v1569_v51 = vadd.f32 %v2197_v50, %v2141_v49  ;;  %v1563_v53 = vpop.f32.mrb[7].mxu1  ;;  %1735 = vst [vmem:[%s2855_s9 + $0x20] sm:$0xff] %v1703_v48  ;;  %1345 = vst [vmem:[%s2857_s29 + $0x30] sm:$0xff] %v1210_v52 }
 0x293   : > { %v1564_v54 = vadd.f32 %v1563_v53, %v1210_v52 }
 0x294   : > { %v1706_v55 = vadd.f32 %v3196_v26, %v1569_v51 }
 0x295   : > { %v1705_v56 = vadd.f32 %v3196_v26, %v1564_v54  ;;  %v2200_v58 = vpop.f32.mrb[8].mxu1 }
 0x296   : > { %v2144_v57 = vpop.f32.mrb[8].mxu0  ;;  %1738 = vst [vmem:[%s2855_s9 + $0x38] sm:$0xff] %v1706_v55  ;;  %v1573_v61 = vpop.f32.mrb[9].mxu1 }
 0x297   : > { %1348 = vst [vmem:[%s2857_s29 + $0x48] sm:$0xff] %v2144_v57  ;;  %v1579_v59 = vadd.f32 %v2200_v58, %v2144_v57  ;;  %v1220_v60 = vpop.f32.mrb[9].mxu0  ;;  %1737 = vst [vmem:[%s2855_s9 + $0x30] sm:$0xff] %v1705_v56 }
 0x298   : > { %1347 = vst [vmem:[%s2857_s29 + $0x40] sm:$0xff] %v1220_v60  ;;  %v1574_v62 = vadd.f32 %v1573_v61, %v1220_v60 }
 0x299   : > { %v1708_v63 = vadd.f32 %v3196_v26, %v1579_v59  ;;  %v2203_v2 = vpop.f32.mrb[10].mxu1 }
 0x29a   : > { %v1707_v0 = vadd.f32 %v3196_v26, %v1574_v62  ;;  %v2147_v1 = vpop.f32.mrb[10].mxu0  ;;  %v1583_v5 = vpop.f32.mrb[11].mxu1 }
 0x29b   : > { %1740 = vst [vmem:[%s2855_s9 + $0x48] sm:$0xff] %v1708_v63  ;;  %1350 = vst [vmem:[%s2857_s29 + $0x58] sm:$0xff] %v2147_v1  ;;  %v1589_v3 = vadd.f32 %v2203_v2, %v2147_v1  ;;  %v1230_v4 = vpop.f32.mrb[11].mxu0 }
 0x29c   : > { %1739 = vst [vmem:[%s2855_s9 + $0x40] sm:$0xff] %v1707_v0  ;;  %1349 = vst [vmem:[%s2857_s29 + $0x50] sm:$0xff] %v1230_v4  ;;  %v1584_v6 = vadd.f32 %v1583_v5, %v1230_v4 }
 0x29d   : > { %v1710_v7 = vadd.f32 %v3196_v26, %v1589_v3  ;;  %v2206_v10 = vpop.f32.mrb[12].mxu1 }
 0x29e   : > { %v1709_v8 = vadd.f32 %v3196_v26, %v1584_v6  ;;  %v2150_v9 = vpop.f32.mrb[12].mxu0  ;;  %v1593_v13 = vpop.f32.mrb[13].mxu1 }
 0x29f   : > { %1742 = vst [vmem:[%s2855_s9 + $0x58] sm:$0xff] %v1710_v7  ;;  %1352 = vst [vmem:[%s2857_s29 + $0x68] sm:$0xff] %v2150_v9  ;;  %v1599_v11 = vadd.f32 %v2206_v10, %v2150_v9  ;;  %v1240_v12 = vpop.f32.mrb[13].mxu0 }
 0x2a0   : > { %1741 = vst [vmem:[%s2855_s9 + $0x50] sm:$0xff] %v1709_v8  ;;  %1351 = vst [vmem:[%s2857_s29 + $0x60] sm:$0xff] %v1240_v12  ;;  %v1594_v14 = vadd.f32 %v1593_v13, %v1240_v12 }
 0x2a1   : > { %v1712_v15 = vadd.f32 %v3196_v26, %v1599_v11  ;;  %v2209_v18 = vpop.f32.mrb[14].mxu1 }
 0x2a2   : > { %v1711_v16 = vadd.f32 %v3196_v26, %v1594_v14  ;;  %v2153_v17 = vpop.f32.mrb[14].mxu0  ;;  %v1603_v21 = vpop.f32.mrb[15].mxu1 }
 0x2a3   : > { %1744 = vst [vmem:[%s2855_s9 + $0x68] sm:$0xff] %v1712_v15  ;;  %1354 = vst [vmem:[%s2857_s29 + $0x78] sm:$0xff] %v2153_v17  ;;  %v1609_v19 = vadd.f32 %v2209_v18, %v2153_v17  ;;  %v1250_v20 = vpop.f32.mrb[15].mxu0 }
 0x2a4   : > { %1743 = vst [vmem:[%s2855_s9 + $0x60] sm:$0xff] %v1711_v16  ;;  %1353 = vst [vmem:[%s2857_s29 + $0x70] sm:$0xff] %v1250_v20  ;;  %v1604_v22 = vadd.f32 %v1603_v21, %v1250_v20 }
 0x2a5   : > { %v1714_v23 = vadd.f32 %v3196_v26, %v1609_v19  ;;  %v2212_v27 = vpop.f32.mrb[16].mxu1 }
 0x2a6   : > { %v1713_v24 = vadd.f32 %v3196_v26, %v1604_v22  ;;  %v2156_v25 = vpop.f32.mrb[16].mxu0  ;;  %v1613_v30 = vpop.f32.mrb[17].mxu1 }
 0x2a7   : > { %1746 = vst [vmem:[%s2855_s9 + $0x78] sm:$0xff] %v1714_v23  ;;  %1356 = vst [vmem:[%s2857_s29 + $0x88] sm:$0xff] %v2156_v25  ;;  %v1619_v28 = vadd.f32 %v2212_v27, %v2156_v25  ;;  %v1260_v29 = vpop.f32.mrb[17].mxu0 }
 0x2a8   : > { %1745 = vst [vmem:[%s2855_s9 + $0x70] sm:$0xff] %v1713_v24  ;;  %1355 = vst [vmem:[%s2857_s29 + $0x80] sm:$0xff] %v1260_v29  ;;  %v1614_v31 = vadd.f32 %v1613_v30, %v1260_v29 }
 0x2a9   : > { %v1716_v32 = vadd.f32 %v3196_v26, %v1619_v28  ;;  %v2215_v35 = vpop.f32.mrb[18].mxu1 }
 0x2aa   : > { %v1715_v33 = vadd.f32 %v3196_v26, %v1614_v31  ;;  %v2159_v34 = vpop.f32.mrb[18].mxu0  ;;  %v1623_v38 = vpop.f32.mrb[19].mxu1 }
 0x2ab   : > { %1748 = vst [vmem:[%s2855_s9 + $0x88] sm:$0xff] %v1716_v32  ;;  %1358 = vst [vmem:[%s2857_s29 + $0x98] sm:$0xff] %v2159_v34  ;;  %v1629_v36 = vadd.f32 %v2215_v35, %v2159_v34  ;;  %v1270_v37 = vpop.f32.mrb[19].mxu0 }
 0x2ac   : > { %1747 = vst [vmem:[%s2855_s9 + $0x80] sm:$0xff] %v1715_v33  ;;  %1357 = vst [vmem:[%s2857_s29 + $0x90] sm:$0xff] %v1270_v37  ;;  %v1624_v39 = vadd.f32 %v1623_v38, %v1270_v37 }
 0x2ad   : > { %v1718_v40 = vadd.f32 %v3196_v26, %v1629_v36  ;;  %v2218_v43 = vpop.f32.mrb[20].mxu1 }
 0x2ae   : > { %v1717_v41 = vadd.f32 %v3196_v26, %v1624_v39  ;;  %v2162_v42 = vpop.f32.mrb[20].mxu0  ;;  %v1633_v46 = vpop.f32.mrb[21].mxu1 }
 0x2af   : > { %1750 = vst [vmem:[%s2855_s9 + $0x98] sm:$0xff] %v1718_v40  ;;  %1360 = vst [vmem:[%s2857_s29 + $0xa8] sm:$0xff] %v2162_v42  ;;  %v1639_v44 = vadd.f32 %v2218_v43, %v2162_v42  ;;  %v1280_v45 = vpop.f32.mrb[21].mxu0 }
 0x2b0   : > { %1749 = vst [vmem:[%s2855_s9 + $0x90] sm:$0xff] %v1717_v41  ;;  %1359 = vst [vmem:[%s2857_s29 + $0xa0] sm:$0xff] %v1280_v45  ;;  %v1634_v47 = vadd.f32 %v1633_v46, %v1280_v45 }
 0x2b1   : > { %v1720_v48 = vadd.f32 %v3196_v26, %v1639_v44  ;;  %v2221_v51 = vpop.f32.mrb[22].mxu1 }
 0x2b2   : > { %v1719_v49 = vadd.f32 %v3196_v26, %v1634_v47  ;;  %v2165_v50 = vpop.f32.mrb[22].mxu0  ;;  %v1643_v54 = vpop.f32.mrb[23].mxu1 }
 0x2b3   : > { %1752 = vst [vmem:[%s2855_s9 + $0xa8] sm:$0xff] %v1720_v48  ;;  %1362 = vst [vmem:[%s2857_s29 + $0xb8] sm:$0xff] %v2165_v50  ;;  %v1649_v52 = vadd.f32 %v2221_v51, %v2165_v50  ;;  %v1290_v53 = vpop.f32.mrb[23].mxu0 }
 0x2b4   : > { %1751 = vst [vmem:[%s2855_s9 + $0xa0] sm:$0xff] %v1719_v49  ;;  %1361 = vst [vmem:[%s2857_s29 + $0xb0] sm:$0xff] %v1290_v53  ;;  %v1644_v55 = vadd.f32 %v1643_v54, %v1290_v53 }
 0x2b5   : > { %v1722_v56 = vadd.f32 %v3196_v26, %v1649_v52  ;;  %v2224_v59 = vpop.f32.mrb[24].mxu1 }
 0x2b6   : > { %v1721_v57 = vadd.f32 %v3196_v26, %v1644_v55  ;;  %v2168_v58 = vpop.f32.mrb[24].mxu0  ;;  %v1653_v62 = vpop.f32.mrb[25].mxu1 }
 0x2b7   : > { %1754 = vst [vmem:[%s2855_s9 + $0xb8] sm:$0xff] %v1722_v56  ;;  %1364 = vst [vmem:[%s2857_s29 + $0xc8] sm:$0xff] %v2168_v58  ;;  %v1659_v60 = vadd.f32 %v2224_v59, %v2168_v58  ;;  %v1300_v61 = vpop.f32.mrb[25].mxu0 }
 0x2b8   : > { %1753 = vst [vmem:[%s2855_s9 + $0xb0] sm:$0xff] %v1721_v57  ;;  %1363 = vst [vmem:[%s2857_s29 + $0xc0] sm:$0xff] %v1300_v61  ;;  %v1654_v63 = vadd.f32 %v1653_v62, %v1300_v61 }
 0x2b9   : > { %v1724_v0 = vadd.f32 %v3196_v26, %v1659_v60  ;;  %v2227_v3 = vpop.f32.mrb[26].mxu1 }
 0x2ba   : > { %v1723_v1 = vadd.f32 %v3196_v26, %v1654_v63  ;;  %v2171_v2 = vpop.f32.mrb[26].mxu0  ;;  %v1663_v6 = vpop.f32.mrb[27].mxu1 }
 0x2bb   : > { %1756 = vst [vmem:[%s2855_s9 + $0xc8] sm:$0xff] %v1724_v0  ;;  %1366 = vst [vmem:[%s2857_s29 + $0xd8] sm:$0xff] %v2171_v2  ;;  %v1669_v4 = vadd.f32 %v2227_v3, %v2171_v2  ;;  %v1310_v5 = vpop.f32.mrb[27].mxu0 }
 0x2bc   : > { %1755 = vst [vmem:[%s2855_s9 + $0xc0] sm:$0xff] %v1723_v1  ;;  %1365 = vst [vmem:[%s2857_s29 + $0xd0] sm:$0xff] %v1310_v5  ;;  %v1664_v7 = vadd.f32 %v1663_v6, %v1310_v5 }
 0x2bd   : > { %v1726_v8 = vadd.f32 %v3196_v26, %v1669_v4  ;;  %v2230_v11 = vpop.f32.mrb[28].mxu1 }
 0x2be   : > { %v1725_v9 = vadd.f32 %v3196_v26, %v1664_v7  ;;  %v2174_v10 = vpop.f32.mrb[28].mxu0  ;;  %v1673_v14 = vpop.f32.mrb[29].mxu1 }
 0x2bf   : > { %1758 = vst [vmem:[%s2855_s9 + $0xd8] sm:$0xff] %v1726_v8  ;;  %1368 = vst [vmem:[%s2857_s29 + $0xe8] sm:$0xff] %v2174_v10  ;;  %v1679_v12 = vadd.f32 %v2230_v11, %v2174_v10  ;;  %v1320_v13 = vpop.f32.mrb[29].mxu0 }
 0x2c0   : > { %1757 = vst [vmem:[%s2855_s9 + $0xd0] sm:$0xff] %v1725_v9  ;;  %1367 = vst [vmem:[%s2857_s29 + $0xe0] sm:$0xff] %v1320_v13  ;;  %v1674_v15 = vadd.f32 %v1673_v14, %v1320_v13 }
 0x2c1   : > { %v1728_v16 = vadd.f32 %v3196_v26, %v1679_v12  ;;  %v2233_v19 = vpop.f32.mrb[30].mxu1 }
 0x2c2   : > { %v1727_v17 = vadd.f32 %v3196_v26, %v1674_v15  ;;  %v2177_v18 = vpop.f32.mrb[30].mxu0  ;;  %v1683_v22 = vpop.f32.mrb[31].mxu1 }
 0x2c3   : > { %1760 = vst [vmem:[%s2855_s9 + $0xe8] sm:$0xff] %v1728_v16  ;;  %1370 = vst [vmem:[%s2857_s29 + $0xf8] sm:$0xff] %v2177_v18  ;;  %v1689_v20 = vadd.f32 %v2233_v19, %v2177_v18  ;;  %v1330_v21 = vpop.f32.mrb[31].mxu0 }
 0x2c4   : > { %1759 = vst [vmem:[%s2855_s9 + $0xe0] sm:$0xff] %v1727_v17  ;;  %1369 = vst [vmem:[%s2857_s29 + $0xf0] sm:$0xff] %v1330_v21  ;;  %v1684_v23 = vadd.f32 %v1683_v22, %v1330_v21 }
 0x2c5   : > { %v1730_v24 = vadd.f32 %v3196_v26, %v1689_v20 }
 0x2c6   : > { %v1729_v25 = vadd.f32 %v3196_v26, %v1684_v23 }
 0x2c7   : > { %1762 = vst [vmem:[%s2855_s9 + $0xf8] sm:$0xff] %v1730_v24 }
 0x2c8   : > { %1761 = vst [vmem:[%s2855_s9 + $0xf0] sm:$0xff] %v1729_v25 }
 0x2c9 PF: > { %s3443_s18 = sld [smem:[#allocation17_spill]]  ;;  %s2048_s17 = sshll.u32 %s2616_s8, 12 }
 0x2ca   : > { %s3444_s12 = sld [smem:[#allocation21_spill]]  ;;  %s1782_s10 = sshll.u32 %s2855_s9, 4  ;;  %s3303_s10 = int_to_ptr.vmem [resolvable:$true] %s1782_s10 }
 0x2cb   : > { %s1764_s19 = scalar_lea.sflag [#allocation5], %s2835_s6  ;;  %s2474_s16 = scalar_lea.vmem %s3303_s10, 4096 }
 0x2cc   : > { %p2475_p0 = scmp.ne.s32.totalorder %s3303_s10, %s2474_s16  ;;  %s2636_s15 = smov [#allocation6]  }
 0x2cd   : > { %s2478_s13 = sshll.u32 %s2636_s15, 4  ;;  %s2479_s13 = int_to_ptr.vmem [resolvable:$false] %s2478_s13 }
 0x2ce   : > { %s2480_s14 = scalar_lea.vmem %s2479_s13, 8192  ;;  %p2481_p10 = scmp.lt.s32.totalorder %s3303_s10, %s2479_s13 }
 0x2cf   : > { %p3445_p1 = scmp.ne.s32.totalorder %s3443_s18, 0  ;;  %p2482_p11 = scmp.lt.s32.totalorder %s2480_s14, %s2474_s16 }
 0x2d0   : > { %s3300_s1 = scalar_lea.hbm %s3444_s12, %s2048_s17 }
 0x2d1   : > { %p2476_p6 = pnand %p2475_p0, %p3445_p1  ;;  %p2483_p13 = por %p2482_p11, %p2481_p10 }
 0x2d3   : > { %p2477_p8 = pneg %p2476_p6 }
 0x2d5   : > { %p2484_p5 = pnand %p2483_p13, %p2477_p8 }
 0x2d7   : > { %2487 = shalt.err (!%p2484_p5)
}
 0x2d8   : > { %s2488_s9 = scalar_lea.hbm %s3300_s1, 4096  ;;  %s2492_s20 = scalar_lea.hbm %s3444_s12, 8192 }
 0x2d9   : > { %p2489_p3 = scmp.ne.s32.totalorder %s3300_s1, %s2488_s9  ;;  %p2493_p2 = scmp.lt.u32.totalorder %s3300_s1, %s3444_s12 }
 0x2da   : > { %p2494_p7 = scmp.lt.u32.totalorder %s2492_s20, %s2488_s9  ;;  %p2496_p0 = scmp.lt.u32.totalorder %s2488_s9, %s3300_s1 }
 0x2db   : > { %p2490_p9 = pnand %p2489_p3, %p3445_p1 }
 0x2dc   : > { %p2495_p4 = por %p2494_p7, %p2493_p2 }
 0x2dd   : > { %p2491_p12 = pneg %p2490_p9 }
 0x2de   : > { %p2497_p6 = por %p2496_p0, %p2495_p4 }
 0x2e0   : > { %p2498_p8 = pnand %p2497_p6, %p2491_p12 }
 0x2e2   : > { %2501 = shalt.err (!%p2498_p8)
}
 0x2e3   : > { %s2637_s16 = smov 128   ;;  %s2638_s15 = smov 8  }
 0x2e4   : > { %2332 = dma.vmem_to_hbm [thread:$0]  (%p3445_p1), %s3303_s10, 4096, %s3300_s1, %s1764_s19, %s2637_s16, %s2637_s16, %s2638_s15  }
 0x2e5   : > { %s3446_s9 = sld [smem:[#allocation22_spill]]  ;;  %s1798_s20 = sshll.u32 %s2857_s29, 4  ;;  %s3340_s20 = int_to_ptr.vmem [resolvable:$true] %s1798_s20 }
 0x2e6   : > { %s1769_s21 = scalar_lea.sflag [#allocation8], %s2835_s6  ;;  %s2502_s22 = scalar_lea.vmem %s3340_s20, 4096 }
 0x2e7   : > { %p2503_p10 = scmp.ne.s32.totalorder %s3340_s20, %s2502_s22  ;;  %s2639_s0 = smov [#allocation7]  }
 0x2e8   : > { %s2506_s1 = sshll.u32 %s2639_s0, 4  ;;  %s2507_s1 = int_to_ptr.vmem [resolvable:$false] %s2506_s1 }
 0x2e9   : > { %p2504_p11 = pnand %p2503_p10, %p3445_p1  ;;  %s2508_s8 = scalar_lea.vmem %s2507_s1, 8192 }
 0x2ea   : > { %p2509_p5 = scmp.lt.s32.totalorder %s3340_s20, %s2507_s1  ;;  %p2510_p3 = scmp.lt.s32.totalorder %s2508_s8, %s2502_s22 }
 0x2eb   : > { %s3447_s23 = smov %s3446_s9  ;;  %s3337_s30 = scalar_lea.hbm %s3446_s9, %s2048_s17 }
 0x2ec   : > { %p2505_p13 = pneg %p2504_p11  ;;  %p2511_p9 = por %p2510_p3, %p2509_p5 }
 0x2ee   : > { %p2512_p12 = pnand %p2511_p9, %p2505_p13 }
 0x2f0   : > { %2515 = shalt.err (!%p2512_p12)
}
 0x2f1   : > { %s2516_s29 = scalar_lea.hbm %s3337_s30, 4096  ;;  %s2520_s0 = scalar_lea.hbm %s3447_s23, 8192 }
 0x2f2   : > { %p2517_p2 = scmp.ne.s32.totalorder %s3337_s30, %s2516_s29  ;;  %p2521_p0 = scmp.lt.u32.totalorder %s3337_s30, %s3447_s23 }
 0x2f3   : > { %p2522_p6 = scmp.lt.u32.totalorder %s2520_s0, %s2516_s29  ;;  %p2524_p10 = scmp.lt.u32.totalorder %s2516_s29, %s3337_s30 }
 0x2f4   : > { %p2518_p7 = pnand %p2517_p2, %p3445_p1 }
 0x2f5   : > { %p2523_p8 = por %p2522_p6, %p2521_p0 }
 0x2f6   : > { %p2519_p4 = pneg %p2518_p7 }
 0x2f7   : > { %p2525_p11 = por %p2524_p10, %p2523_p8 }
 0x2f9   : > { %p2526_p13 = pnand %p2525_p11, %p2519_p4 }
 0x2fb   : > { %2529 = shalt.err (!%p2526_p13)
}
 0x2fc   : > { %2333 = dma.vmem_to_hbm [thread:$0]  (%p3445_p1), %s3340_s20, 4096, %s3337_s30, %s1769_s21, %s2637_s16, %s2637_s16, %s2638_s15  }
 0x2fd PF: > { %p2348_p5 = scmp.ge.s32.totalorder %s2628_s11, 2  ;;  %s1813_s14 = sand.u32 1, %s2588_s24  }
 0x2fe   : > { %p3448_p3 = scmp.ne.s32.totalorder %s3438_s7, 0  ;;  %s1814_s9 = scalar_lea.sflag [#allocation5], %s1813_s14 }
 0x300   : > { %p2341_p9 = pnand %p2348_p5, %p3448_p3 }
 0x302   : > { %2579 = dma.done.wait (!%p2341_p9), %s1814_s9, 4096  }
 0x303   : > { %2581 = vsyncadd (!%p2341_p9), %s1814_s9, 4294963200  ;;  %s1823_s18 = scalar_lea.sflag [#allocation8], %s1813_s14 }
 0x304   : > { %2583 = dma.done.wait (!%p2341_p9), %s1823_s18, 4096  }
 0x305   : > { %2585 = vsyncadd (!%p2341_p9), %s1823_s18, 4294963200  ;;  %s27_s11 = sadd.s32 1, %s2628_s11   ;;  %s3449_s6 = sld [smem:[#allocation12_spill]] }
 0x306   : > { %p24_p12 = scmp.ge.s32.totalorder %s27_s11, 6   ;;  %s3450_s29 = sld [smem:[#allocation18_spill]] }
 0x307   : > { %s3451_s30 = sld [smem:[#allocation13_spill]]  ;;  %s3452_s8 = sld [smem:[#allocation14_spill]] }
 0x308   : > { %s3453_s9 = sld [smem:[#allocation15_spill]]  ;;  %s3454_s10 = sld [smem:[#allocation16_spill]] }
 0x309   : > { %s3455_s24 = smov %s2592_s25  ;;  %s3456_s25 = smov %s2596_s26 }
 0x30a   : > { %s3457_s26 = smov %s2767_s27  ;;  %s3458_s27 = smov %s2604_s28 }
 0x30b   : > { %s3459_s28 = smov %s3449_s6  ;;  %26 = sbr.rel (!%p24_p12) target bundleno = 16 (0x10), region = 123 }
 0x312   :  { %1828 = vsyncpa [#allocation4], 1 }
 0x313   :  { %1830 = vsyncpa [#allocation4 + $0x1], 1 }
 0x314   :  { %1831 = vsyncpa [#allocation5], 1 }
 0x315   :  { %1833 = vsyncpa [#allocation5 + $0x1], 1 }
 0x316   :  { %1834 = vsyncpa [#allocation8], 1 }
 0x317   :  { %1836 = vsyncpa [#allocation8 + $0x1], 1 }

</bundles_post_ra>
